<compile_context>
chip_gen: v7x
topology: tpu7x:2x2x1
jax: 0.10.0
libtpu: 0.0.40
codegen_flags: <defaults>
</compile_context>

<pallas_src>
import functools

import numpy as np
import jax
import jax.numpy as jnp
from jax import lax
from jax.experimental import pallas as pl
from jax.experimental.pallas import tpu as pltpu


# ----------------------------------------------------------------------------
# helpers
# ----------------------------------------------------------------------------

_VMEM_LIMIT = 32 * 1024 * 1024  # explicit scoped-VMEM budget, safe on v5e/v6e/v7x


def _resident_spec(shape):
    """Block covering the whole array; same block at every grid step."""
    zeros = (0,) * len(shape)
    return pl.BlockSpec(shape, lambda *_: zeros)


def _pick_tile(n, prefs=(512, 256, 128)):
    """Largest preferred (lane/sublane friendly) tile dividing n, else n."""
    for p in prefs:
        if n % p == 0:
            return p
    return n


def _layernorm(y, g, b, eps):
    mu = jnp.mean(y, axis=-1, keepdims=True)
    var = jnp.mean(jnp.square(y - mu), axis=-1, keepdims=True)
    return (y - mu) * lax.rsqrt(var + eps) * g + b


# ----------------------------------------------------------------------------
# "weighted-cosine": (a) row-tiled layer stack -> xn, (b) tiled score
# ----------------------------------------------------------------------------

def _wc_stack_kernel(x_ref, lin_w, lin_b,
                     enc_wv, enc_fcw, enc_fcb, enc_lng, enc_lnb,
                     ffn_w1, ffn_b1, ffn_w2, ffn_b2, ffn_lng, ffn_lnb,
                     xn_ref, *, n_lin, n_attn, eps, cdt):
    x = x_ref[...]                                            # (TR, D) f32

    # gl_linear_i stack : Linear(D, D) + bias  (matmuls in cdt, acc in f32)
    for i in range(n_lin):
        x = jnp.dot(x.astype(cdt), lin_w[i],
                    preferred_element_type=jnp.float32) + lin_b[i]

    # EncodeLayer + FeedForwardLayer stack (modal_num == 1)
    for i in range(n_attn):
        res = x
        # softmax over a single key == 1  ->  attention output == V projection
        v = jnp.dot(x.astype(cdt), enc_wv[i],
                    preferred_element_type=jnp.float32)
        fc = jnp.dot(v.astype(cdt), enc_fcw[i],
                     preferred_element_type=jnp.float32) + enc_fcb[i]
        y = _layernorm(fc + res, enc_lng[i], enc_lnb[i], eps)
        h = jnp.maximum(
            jnp.dot(y.astype(cdt), ffn_w1[i],
                    preferred_element_type=jnp.float32) + ffn_b1[i], 0.0)
        z = jnp.dot(h.astype(cdt), ffn_w2[i],
                    preferred_element_type=jnp.float32) + ffn_b2[i] + y
        x = _layernorm(z, ffn_lng[i], ffn_lnb[i], eps)

    # F.normalize(x, dim=-1)  (p=2, eps=1e-12), via EUP rsqrt, in f32
    sumsq = jnp.sum(x * x, axis=-1, keepdims=True)
    xn_ref[...] = x * lax.rsqrt(jnp.maximum(sumsq, 1e-24))


def _wc_score_kernel(xi_ref, xj_ref, out_ref, *, th):
    score = lax.dot_general(xi_ref[...], xj_ref[...],
                            (((1,), (1,)), ((), ())),
                            preferred_element_type=jnp.float32)
    out_ref[...] = jnp.where(score > th, score, 0.0)


def weighted_cosine(x, params, hp):
    num, d = x.shape
    cdt = params["lin_w"].dtype
    weights = [params[k] for k in (
        "lin_w", "lin_b", "enc_wv", "enc_fcw", "enc_fcb", "enc_lng", "enc_lnb",
        "ffn_w1", "ffn_b1", "ffn_w2", "ffn_b2", "ffn_lng", "ffn_lnb")]

    # --- phase A: layer stack, tiled over rows, weights resident in VMEM ----
    tr = _pick_tile(num, (512, 256, 128))
    stack = functools.partial(
        _wc_stack_kernel, n_lin=int(hp.gl_lin_layer),
        n_attn=int(hp.gl_attn_layer), eps=1e-6, cdt=cdt)
    xn = pl.pallas_call(
        stack,
        grid=(num // tr,),
        in_specs=[pl.BlockSpec((tr, d), lambda i: (i, 0))]
                 + [_resident_spec(w.shape) for w in weights],
        out_specs=pl.BlockSpec((tr, d), lambda i: (i, 0)),
        out_shape=jax.ShapeDtypeStruct((num, d), jnp.float32),
        compiler_params=pltpu.CompilerParams(
            dimension_semantics=("parallel",),
            vmem_limit_bytes=_VMEM_LIMIT),
    )(x, *weights)

    # --- phase B: score = xn @ xn.T, thresholded, tiled (i, j) grid ---------
    tm = _pick_tile(num, (256, 128))
    tn = _pick_tile(num, (512, 256, 128))
    return pl.pallas_call(
        functools.partial(_wc_score_kernel, th=float(hp.th)),
        grid=(num // tm, num // tn),
        in_specs=[pl.BlockSpec((tm, d), lambda i, j: (i, 0)),
                  pl.BlockSpec((tn, d), lambda i, j: (j, 0))],
        out_specs=pl.BlockSpec((tm, tn), lambda i, j: (i, j)),
        out_shape=jax.ShapeDtypeStruct((num, num), jnp.float32),
        compiler_params=pltpu.CompilerParams(
            dimension_semantics=("parallel", "parallel"),
            vmem_limit_bytes=_VMEM_LIMIT),
    )(xn, xn)


# ----------------------------------------------------------------------------
# "sigmoid-like": Gram-matrix pairwise distance, tiled (i, j) grid
# ----------------------------------------------------------------------------

def _sigmoid_like_kernel(xi_ref, xj_ref, sqi_ref, sqj_ref, thr_ref, t_ref,
                         out_ref):
    g = lax.dot_general(xi_ref[...], xj_ref[...],
                        (((1,), (1,)), ((), ())),
                        preferred_element_type=jnp.float32)      # (TM, TN) MXU
    d2 = sqi_ref[...] + sqj_ref[...] - 2.0 * g
    tm, tn = out_ref.shape
    ri = pl.program_id(0) * tm + lax.broadcasted_iota(jnp.int32, (tm, tn), 0)
    cj = pl.program_id(1) * tn + lax.broadcasted_iota(jnp.int32, (tm, tn), 1)
    # clamp round-off negatives; self-distance is exactly 0 (matches reference)
    d2 = jnp.where(ri == cj, 0.0, jnp.maximum(d2, 0.0))
    dist = jnp.sqrt(d2)
    z = (dist + thr_ref[0, 0]) * t_ref[0, 0]
    # 1 - sigmoid(z) == 1 / (1 + exp(z))
    out_ref[...] = pl.reciprocal(1.0 + jnp.exp(z), approx=True)


def sigmoid_like(x, threshold, t):
    num, d = x.shape
    sq = jnp.sum(x * x, axis=1, keepdims=True)        # (num, 1) tiny precompute
    sq_t = sq.reshape(1, num)                          # (1, num)
    tm = _pick_tile(num, (256, 128))
    tn = _pick_tile(num, (512, 256, 128))
    return pl.pallas_call(
        _sigmoid_like_kernel,
        grid=(num // tm, num // tn),
        in_specs=[pl.BlockSpec((tm, d), lambda i, j: (i, 0)),
                  pl.BlockSpec((tn, d), lambda i, j: (j, 0)),
                  pl.BlockSpec((tm, 1), lambda i, j: (i, 0)),
                  pl.BlockSpec((1, tn), lambda i, j: (0, j)),
                  _resident_spec(threshold.shape),
                  _resident_spec(t.shape)],
        out_specs=pl.BlockSpec((tm, tn), lambda i, j: (i, j)),
        out_shape=jax.ShapeDtypeStruct((num, num), jnp.float32),
        compiler_params=pltpu.CompilerParams(
            dimension_semantics=("parallel", "parallel"),
            vmem_limit_bytes=_VMEM_LIMIT),
    )(x, x, sq, sq_t, threshold, t)


# ----------------------------------------------------------------------------
# "adaptive-learning": tiled over i-row blocks, full j row for the softmax
# ----------------------------------------------------------------------------

def _adaptive_kernel(xi_ref, x_ref, w_ref, b_ref, out_ref):
    xi = xi_ref[...]                                           # (TM, D)
    xall = x_ref[...]                                          # (num, D)
    d = jnp.abs(xi[:, None, :] - xall[None, :, :])             # (TM, num, D)
    s = jnp.sum(d * w_ref[...], axis=-1) + b_ref[0, 0]         # Linear(D, 1)
    s = jnp.maximum(s, 0.0)                                    # ReLU
    s = s - jnp.max(s, axis=-1, keepdims=True)                 # row softmax
    e = jnp.exp(s)
    out_ref[...] = e * pl.reciprocal(jnp.sum(e, axis=-1, keepdims=True))


def adaptive_learning(x, w, b):
    num, d = x.shape
    tm = _pick_tile(num, (128,))    # bounds the (TM, num, D) intermediate
    return pl.pallas_call(
        _adaptive_kernel,
        grid=(num // tm,),
        in_specs=[pl.BlockSpec((tm, d), lambda i: (i, 0)),
                  _resident_spec(x.shape),
                  _resident_spec(w.shape),
                  _resident_spec(b.shape)],
        out_specs=pl.BlockSpec((tm, num), lambda i: (i, 0)),
        out_shape=jax.ShapeDtypeStruct((num, num), jnp.float32),
        compiler_params=pltpu.CompilerParams(
            dimension_semantics=("parallel",),
            vmem_limit_bytes=_VMEM_LIMIT),
    )(x, x, w, b)


# ----------------------------------------------------------------------------
# GraphLearn forward dispatcher
# ----------------------------------------------------------------------------

def graph_learn_forward(params, x, hp, mode=None):
    mode = hp.GC_mode if mode is None else mode
    if mode == "sigmoid-like":
        return sigmoid_like(x, params["sig_threshold"], params["sig_t"])
    if mode == "adaptive-learning":
        return adaptive_learning(x, params["adp_w"], params["adp_b"])
    if mode == "weighted-cosine":
        return weighted_cosine(x, params, hp)
    raise ValueError(f"unknown GC_mode: {mode}")


# ----------------------------------------------------------------------------
# deterministic synthetic parameters
# ----------------------------------------------------------------------------

def init_params(key, input_dim, hp, matmul_dtype=jnp.bfloat16):
    D = input_dim
    assert D == hp.n_head * hp.n_hidden, \
        "GraphLearn attention layers require input_dim == n_head * n_hidden"
    L1 = max(int(hp.gl_lin_layer), 1)
    L2 = max(int(hp.gl_attn_layer), 1)
    ks = iter(jax.random.split(key, 64))

    def w(shape, fan_in, dtype=jnp.float32):
        return (jax.random.normal(next(ks), shape, jnp.float32)
                / np.sqrt(fan_in)).astype(dtype)

    return {
        # gl_linear_i : Linear(D, D) (square weights stored in bf16 for MXU)
        "lin_w": w((L1, D, D), D, matmul_dtype),
        "lin_b": 0.01 * jax.random.normal(next(ks), (L1, 1, D), jnp.float32),
        # EncodeLayer i (only parts reachable with modal_num==1; Q/K are dead)
        "enc_wv": w((L2, D, D), D, matmul_dtype),
        "enc_fcw": w((L2, D, D), D, matmul_dtype),
        "enc_fcb": jnp.zeros((L2, 1, D), jnp.float32),
        "enc_lng": jnp.ones((L2, 1, D), jnp.float32),
        "enc_lnb": jnp.zeros((L2, 1, D), jnp.float32),
        # FeedForwardLayer i  (d_hid == d_in == D)
        "ffn_w1": w((L2, D, D), D, matmul_dtype),
        "ffn_b1": jnp.zeros((L2, 1, D), jnp.float32),
        "ffn_w2": w((L2, D, D), D, matmul_dtype),
        "ffn_b2": jnp.zeros((L2, 1, D), jnp.float32),
        "ffn_lng": jnp.ones((L2, 1, D), jnp.float32),
        "ffn_lnb": jnp.zeros((L2, 1, D), jnp.float32),
        # sigmoid-like parameters: threshold = zeros(1), t = ones(1)
        "sig_threshold": jnp.zeros((1, 1), jnp.float32),
        "sig_t": jnp.ones((1, 1), jnp.float32),
        # adaptive-learning: self.w = nn.Linear(input_dim, 1)
        "adp_w": w((1, 1, D), D),
        "adp_b": jnp.zeros((1, 1), jnp.float32),
    }


# ----------------------------------------------------------------------------
# demo
# ----------------------------------------------------------------------------

if __name__ == "__main__":
    class Hyperpm:
        GC_mode = "weighted-cosine"
        th = 0.2
        dataname = "synthetic"
        n_hidden = 32
        n_head = 4
        dropout = 0.3            # identity at eval time
        gl_lin_layer = 2
        gl_attn_layer = 2

    hp = Hyperpm()
    num = 8                                  # number of graph nodes (small demo)
    input_dim = hp.n_head * hp.n_hidden      # 128 (lane-dense feature dim)

    key = jax.random.PRNGKey(0)
    pkey, xkey = jax.random.split(key)
    params = init_params(pkey, input_dim, hp)
    x = jax.random.normal(xkey, (num, input_dim), jnp.float32)

    out_wc = graph_learn_forward(params, x, hp, mode="weighted-cosine")
    out_sl = graph_learn_forward(params, x, hp, mode="sigmoid-like")
    out_al = graph_learn_forward(params, x, hp, mode="adaptive-learning")
    jax.block_until_ready((out_wc, out_sl, out_al))

    assert out_wc.shape == (num, num)
    assert out_sl.shape == (num, num)
    assert out_al.shape == (num, num)
    # sanity: cosine diagonal == 1 (normalize/score in f32; survives >th mask)
    assert np.allclose(np.diag(np.asarray(out_wc)), 1.0, atol=1e-3)
    # sanity: adaptive-learning rows are softmax-normalized
    assert np.allclose(np.asarray(out_al).sum(axis=1), 1.0, atol=1e-4)
    # sanity: sigmoid-like diagonal == 1 - sigmoid(0) == 0.5
    assert np.allclose(np.diag(np.asarray(out_sl)), 0.5, atol=1e-3)

    print("KERNEL_OK")
</pallas_src>

<mosaic_0001>
module attributes {stable_mosaic.version = 11 : i64} {
  func.func @_wc_stack_kernel(%arg0: i32, %arg1: memref<8x128xf32, #tpu.memory_space<vmem>>, %arg2: memref<2x128x128xbf16, #tpu.memory_space<vmem>>, %arg3: memref<2x1x128xf32, #tpu.memory_space<vmem>>, %arg4: memref<2x128x128xbf16, #tpu.memory_space<vmem>>, %arg5: memref<2x128x128xbf16, #tpu.memory_space<vmem>>, %arg6: memref<2x1x128xf32, #tpu.memory_space<vmem>>, %arg7: memref<2x1x128xf32, #tpu.memory_space<vmem>>, %arg8: memref<2x1x128xf32, #tpu.memory_space<vmem>>, %arg9: memref<2x128x128xbf16, #tpu.memory_space<vmem>>, %arg10: memref<2x1x128xf32, #tpu.memory_space<vmem>>, %arg11: memref<2x128x128xbf16, #tpu.memory_space<vmem>>, %arg12: memref<2x1x128xf32, #tpu.memory_space<vmem>>, %arg13: memref<2x1x128xf32, #tpu.memory_space<vmem>>, %arg14: memref<2x1x128xf32, #tpu.memory_space<vmem>>, %arg15: memref<8x128xf32, #tpu.memory_space<vmem>>) attributes {dimension_semantics = [#tpu.dimension_semantics<parallel>], iteration_bounds = array<i64: 1>, scalar_prefetch = 0 : i64, scratch_operands = 0 : i64, tpu.core_type = #tpu.core_type<tc>, window_params = [{transform_indices = @transform_0, window_bounds = array<i64: 8, 128>}, {pipeline_mode = #tpu.pipeline_mode<synchronous>, transform_indices = @transform_1, window_bounds = array<i64: 2, 128, 128>}, {pipeline_mode = #tpu.pipeline_mode<synchronous>, transform_indices = @transform_2, window_bounds = array<i64: 2, 1, 128>}, {pipeline_mode = #tpu.pipeline_mode<synchronous>, transform_indices = @transform_3, window_bounds = array<i64: 2, 128, 128>}, {pipeline_mode = #tpu.pipeline_mode<synchronous>, transform_indices = @transform_4, window_bounds = array<i64: 2, 128, 128>}, {pipeline_mode = #tpu.pipeline_mode<synchronous>, transform_indices = @transform_5, window_bounds = array<i64: 2, 1, 128>}, {pipeline_mode = #tpu.pipeline_mode<synchronous>, transform_indices = @transform_6, window_bounds = array<i64: 2, 1, 128>}, {pipeline_mode = #tpu.pipeline_mode<synchronous>, transform_indices = @transform_7, window_bounds = array<i64: 2, 1, 128>}, {pipeline_mode = #tpu.pipeline_mode<synchronous>, transform_indices = @transform_8, window_bounds = array<i64: 2, 128, 128>}, {pipeline_mode = #tpu.pipeline_mode<synchronous>, transform_indices = @transform_9, window_bounds = array<i64: 2, 1, 128>}, {pipeline_mode = #tpu.pipeline_mode<synchronous>, transform_indices = @transform_10, window_bounds = array<i64: 2, 128, 128>}, {pipeline_mode = #tpu.pipeline_mode<synchronous>, transform_indices = @transform_11, window_bounds = array<i64: 2, 1, 128>}, {pipeline_mode = #tpu.pipeline_mode<synchronous>, transform_indices = @transform_12, window_bounds = array<i64: 2, 1, 128>}, {pipeline_mode = #tpu.pipeline_mode<synchronous>, transform_indices = @transform_13, window_bounds = array<i64: 2, 1, 128>}, {transform_indices = @transform_14, window_bounds = array<i64: 8, 128>}]} {
    %c0 = arith.constant 0 : index
    %c0_0 = arith.constant 0 : index
    %0 = vector.load %arg1[%c0, %c0_0] : memref<8x128xf32, #tpu.memory_space<vmem>>, vector<8x128xf32>
    %1 = arith.truncf %0 : vector<8x128xf32> to vector<8x128xbf16>
    %c0_1 = arith.constant 0 : index
    %c0_2 = arith.constant 0 : index
    %c0_3 = arith.constant 0 : index
    %2 = vector.load %arg2[%c0_1, %c0_2, %c0_3] : memref<2x128x128xbf16, #tpu.memory_space<vmem>>, vector<1x128x128xbf16>
    %3 = vector.shape_cast %2 : vector<1x128x128xbf16> to vector<128x128xbf16>
    %cst = arith.constant dense<0.000000e+00> : vector<8x128xf32>
    %4 = tpu.matmul %1, %3, %cst {dimension_numbers = #tpu.dot_dimension_numbers<[1], [0], [0], [1], [0, 0, 1, 1], [], []>} : vector<8x128xbf16>, vector<128x128xbf16>, vector<8x128xf32> -> vector<8x128xf32>
    %c0_4 = arith.constant 0 : index
    %c0_5 = arith.constant 0 : index
    %c0_6 = arith.constant 0 : index
    %5 = vector.load %arg3[%c0_4, %c0_5, %c0_6] : memref<2x1x128xf32, #tpu.memory_space<vmem>>, vector<1x1x128xf32>
    %6 = vector.shape_cast %5 : vector<1x1x128xf32> to vector<1x128xf32>
    %7 = vector.broadcast %6 : vector<1x128xf32> to vector<8x128xf32>
    %8 = arith.addf %4, %7 : vector<8x128xf32>
    %9 = arith.truncf %8 : vector<8x128xf32> to vector<8x128xbf16>
    %c1 = arith.constant 1 : index
    %c0_7 = arith.constant 0 : index
    %c0_8 = arith.constant 0 : index
    %10 = vector.load %arg2[%c1, %c0_7, %c0_8] : memref<2x128x128xbf16, #tpu.memory_space<vmem>>, vector<1x128x128xbf16>
    %11 = vector.shape_cast %10 : vector<1x128x128xbf16> to vector<128x128xbf16>
    %cst_9 = arith.constant dense<0.000000e+00> : vector<8x128xf32>
    %12 = tpu.matmul %9, %11, %cst_9 {dimension_numbers = #tpu.dot_dimension_numbers<[1], [0], [0], [1], [0, 0, 1, 1], [], []>} : vector<8x128xbf16>, vector<128x128xbf16>, vector<8x128xf32> -> vector<8x128xf32>
    %c1_10 = arith.constant 1 : index
    %c0_11 = arith.constant 0 : index
    %c0_12 = arith.constant 0 : index
    %13 = vector.load %arg3[%c1_10, %c0_11, %c0_12] : memref<2x1x128xf32, #tpu.memory_space<vmem>>, vector<1x1x128xf32>
    %14 = vector.shape_cast %13 : vector<1x1x128xf32> to vector<1x128xf32>
    %15 = vector.broadcast %14 : vector<1x128xf32> to vector<8x128xf32>
    %16 = arith.addf %12, %15 : vector<8x128xf32>
    %17 = arith.truncf %16 : vector<8x128xf32> to vector<8x128xbf16>
    %c0_13 = arith.constant 0 : index
    %c0_14 = arith.constant 0 : index
    %c0_15 = arith.constant 0 : index
    %18 = vector.load %arg4[%c0_13, %c0_14, %c0_15] : memref<2x128x128xbf16, #tpu.memory_space<vmem>>, vector<1x128x128xbf16>
    %19 = vector.shape_cast %18 : vector<1x128x128xbf16> to vector<128x128xbf16>
    %cst_16 = arith.constant dense<0.000000e+00> : vector<8x128xf32>
    %20 = tpu.matmul %17, %19, %cst_16 {dimension_numbers = #tpu.dot_dimension_numbers<[1], [0], [0], [1], [0, 0, 1, 1], [], []>} : vector<8x128xbf16>, vector<128x128xbf16>, vector<8x128xf32> -> vector<8x128xf32>
    %21 = arith.truncf %20 : vector<8x128xf32> to vector<8x128xbf16>
    %c0_17 = arith.constant 0 : index
    %c0_18 = arith.constant 0 : index
    %c0_19 = arith.constant 0 : index
    %22 = vector.load %arg5[%c0_17, %c0_18, %c0_19] : memref<2x128x128xbf16, #tpu.memory_space<vmem>>, vector<1x128x128xbf16>
    %23 = vector.shape_cast %22 : vector<1x128x128xbf16> to vector<128x128xbf16>
    %cst_20 = arith.constant dense<0.000000e+00> : vector<8x128xf32>
    %24 = tpu.matmul %21, %23, %cst_20 {dimension_numbers = #tpu.dot_dimension_numbers<[1], [0], [0], [1], [0, 0, 1, 1], [], []>} : vector<8x128xbf16>, vector<128x128xbf16>, vector<8x128xf32> -> vector<8x128xf32>
    %c0_21 = arith.constant 0 : index
    %c0_22 = arith.constant 0 : index
    %c0_23 = arith.constant 0 : index
    %25 = vector.load %arg6[%c0_21, %c0_22, %c0_23] : memref<2x1x128xf32, #tpu.memory_space<vmem>>, vector<1x1x128xf32>
    %26 = vector.shape_cast %25 : vector<1x1x128xf32> to vector<1x128xf32>
    %27 = vector.broadcast %26 : vector<1x128xf32> to vector<8x128xf32>
    %28 = arith.addf %24, %27 : vector<8x128xf32>
    %29 = arith.addf %28, %16 : vector<8x128xf32>
    %c0_24 = arith.constant 0 : index
    %c0_25 = arith.constant 0 : index
    %c0_26 = arith.constant 0 : index
    %30 = vector.load %arg7[%c0_24, %c0_25, %c0_26] : memref<2x1x128xf32, #tpu.memory_space<vmem>>, vector<1x1x128xf32>
    %31 = vector.shape_cast %30 : vector<1x1x128xf32> to vector<1x128xf32>
    %c0_27 = arith.constant 0 : index
    %c0_28 = arith.constant 0 : index
    %c0_29 = arith.constant 0 : index
    %32 = vector.load %arg8[%c0_27, %c0_28, %c0_29] : memref<2x1x128xf32, #tpu.memory_space<vmem>>, vector<1x1x128xf32>
    %33 = vector.shape_cast %32 : vector<1x1x128xf32> to vector<1x128xf32>
    %cst_30 = arith.constant dense<0.000000e+00> : vector<8xf32>
    %34 = vector.multi_reduction <add>, %29, %cst_30 [1] : vector<8x128xf32> to vector<8xf32>
    %35 = vector.shape_cast %34 : vector<8xf32> to vector<8x1xf32>
    %cst_31 = arith.constant 1.280000e+02 : f32
    %36 = vector.broadcast %cst_31 : f32 to vector<8x1xf32>
    %37 = arith.divf %35, %36 : vector<8x1xf32>
    %38 = vector.broadcast %37 : vector<8x1xf32> to vector<8x128xf32>
    %39 = arith.subf %29, %38 : vector<8x128xf32>
    %40 = arith.mulf %39, %39 : vector<8x128xf32>
    %cst_32 = arith.constant dense<0.000000e+00> : vector<8xf32>
    %41 = vector.multi_reduction <add>, %40, %cst_32 [1] : vector<8x128xf32> to vector<8xf32>
    %42 = vector.shape_cast %41 : vector<8xf32> to vector<8x1xf32>
    %cst_33 = arith.constant 1.280000e+02 : f32
    %43 = vector.broadcast %cst_33 : f32 to vector<8x1xf32>
    %44 = arith.divf %42, %43 : vector<8x1xf32>
    %45 = vector.broadcast %37 : vector<8x1xf32> to vector<8x128xf32>
    %46 = arith.subf %29, %45 : vector<8x128xf32>
    %cst_34 = arith.constant 9.99999997E-7 : f32
    %47 = vector.broadcast %cst_34 : f32 to vector<8x1xf32>
    %48 = arith.addf %44, %47 : vector<8x1xf32>
    %49 = math.rsqrt %48 : vector<8x1xf32>
    %50 = vector.broadcast %49 : vector<8x1xf32> to vector<8x128xf32>
    %51 = arith.mulf %46, %50 : vector<8x128xf32>
    %52 = vector.broadcast %31 : vector<1x128xf32> to vector<8x128xf32>
    %53 = arith.mulf %51, %52 : vector<8x128xf32>
    %54 = vector.broadcast %33 : vector<1x128xf32> to vector<8x128xf32>
    %55 = arith.addf %53, %54 : vector<8x128xf32>
    %56 = arith.truncf %55 : vector<8x128xf32> to vector<8x128xbf16>
    %c0_35 = arith.constant 0 : index
    %c0_36 = arith.constant 0 : index
    %c0_37 = arith.constant 0 : index
    %57 = vector.load %arg9[%c0_35, %c0_36, %c0_37] : memref<2x128x128xbf16, #tpu.memory_space<vmem>>, vector<1x128x128xbf16>
    %58 = vector.shape_cast %57 : vector<1x128x128xbf16> to vector<128x128xbf16>
    %cst_38 = arith.constant dense<0.000000e+00> : vector<8x128xf32>
    %59 = tpu.matmul %56, %58, %cst_38 {dimension_numbers = #tpu.dot_dimension_numbers<[1], [0], [0], [1], [0, 0, 1, 1], [], []>} : vector<8x128xbf16>, vector<128x128xbf16>, vector<8x128xf32> -> vector<8x128xf32>
    %c0_39 = arith.constant 0 : index
    %c0_40 = arith.constant 0 : index
    %c0_41 = arith.constant 0 : index
    %60 = vector.load %arg10[%c0_39, %c0_40, %c0_41] : memref<2x1x128xf32, #tpu.memory_space<vmem>>, vector<1x1x128xf32>
    %61 = vector.shape_cast %60 : vector<1x1x128xf32> to vector<1x128xf32>
    %62 = vector.broadcast %61 : vector<1x128xf32> to vector<8x128xf32>
    %63 = arith.addf %59, %62 : vector<8x128xf32>
    %cst_42 = arith.constant 0.000000e+00 : f32
    %64 = vector.broadcast %cst_42 : f32 to vector<8x128xf32>
    %65 = arith.maximumf %63, %64 : vector<8x128xf32>
    %66 = arith.truncf %65 : vector<8x128xf32> to vector<8x128xbf16>
    %c0_43 = arith.constant 0 : index
    %c0_44 = arith.constant 0 : index
    %c0_45 = arith.constant 0 : index
    %67 = vector.load %arg11[%c0_43, %c0_44, %c0_45] : memref<2x128x128xbf16, #tpu.memory_space<vmem>>, vector<1x128x128xbf16>
    %68 = vector.shape_cast %67 : vector<1x128x128xbf16> to vector<128x128xbf16>
    %cst_46 = arith.constant dense<0.000000e+00> : vector<8x128xf32>
    %69 = tpu.matmul %66, %68, %cst_46 {dimension_numbers = #tpu.dot_dimension_numbers<[1], [0], [0], [1], [0, 0, 1, 1], [], []>} : vector<8x128xbf16>, vector<128x128xbf16>, vector<8x128xf32> -> vector<8x128xf32>
    %c0_47 = arith.constant 0 : index
    %c0_48 = arith.constant 0 : index
    %c0_49 = arith.constant 0 : index
    %70 = vector.load %arg12[%c0_47, %c0_48, %c0_49] : memref<2x1x128xf32, #tpu.memory_space<vmem>>, vector<1x1x128xf32>
    %71 = vector.shape_cast %70 : vector<1x1x128xf32> to vector<1x128xf32>
    %72 = vector.broadcast %71 : vector<1x128xf32> to vector<8x128xf32>
    %73 = arith.addf %69, %72 : vector<8x128xf32>
    %74 = arith.addf %73, %55 : vector<8x128xf32>
    %c0_50 = arith.constant 0 : index
    %c0_51 = arith.constant 0 : index
    %c0_52 = arith.constant 0 : index
    %75 = vector.load %arg13[%c0_50, %c0_51, %c0_52] : memref<2x1x128xf32, #tpu.memory_space<vmem>>, vector<1x1x128xf32>
    %76 = vector.shape_cast %75 : vector<1x1x128xf32> to vector<1x128xf32>
    %c0_53 = arith.constant 0 : index
    %c0_54 = arith.constant 0 : index
    %c0_55 = arith.constant 0 : index
    %77 = vector.load %arg14[%c0_53, %c0_54, %c0_55] : memref<2x1x128xf32, #tpu.memory_space<vmem>>, vector<1x1x128xf32>
    %78 = vector.shape_cast %77 : vector<1x1x128xf32> to vector<1x128xf32>
    %cst_56 = arith.constant dense<0.000000e+00> : vector<8xf32>
    %79 = vector.multi_reduction <add>, %74, %cst_56 [1] : vector<8x128xf32> to vector<8xf32>
    %80 = vector.shape_cast %79 : vector<8xf32> to vector<8x1xf32>
    %cst_57 = arith.constant 1.280000e+02 : f32
    %81 = vector.broadcast %cst_57 : f32 to vector<8x1xf32>
    %82 = arith.divf %80, %81 : vector<8x1xf32>
    %83 = vector.broadcast %82 : vector<8x1xf32> to vector<8x128xf32>
    %84 = arith.subf %74, %83 : vector<8x128xf32>
    %85 = arith.mulf %84, %84 : vector<8x128xf32>
    %cst_58 = arith.constant dense<0.000000e+00> : vector<8xf32>
    %86 = vector.multi_reduction <add>, %85, %cst_58 [1] : vector<8x128xf32> to vector<8xf32>
    %87 = vector.shape_cast %86 : vector<8xf32> to vector<8x1xf32>
    %cst_59 = arith.constant 1.280000e+02 : f32
    %88 = vector.broadcast %cst_59 : f32 to vector<8x1xf32>
    %89 = arith.divf %87, %88 : vector<8x1xf32>
    %90 = vector.broadcast %82 : vector<8x1xf32> to vector<8x128xf32>
    %91 = arith.subf %74, %90 : vector<8x128xf32>
    %cst_60 = arith.constant 9.99999997E-7 : f32
    %92 = vector.broadcast %cst_60 : f32 to vector<8x1xf32>
    %93 = arith.addf %89, %92 : vector<8x1xf32>
    %94 = math.rsqrt %93 : vector<8x1xf32>
    %95 = vector.broadcast %94 : vector<8x1xf32> to vector<8x128xf32>
    %96 = arith.mulf %91, %95 : vector<8x128xf32>
    %97 = vector.broadcast %76 : vector<1x128xf32> to vector<8x128xf32>
    %98 = arith.mulf %96, %97 : vector<8x128xf32>
    %99 = vector.broadcast %78 : vector<1x128xf32> to vector<8x128xf32>
    %100 = arith.addf %98, %99 : vector<8x128xf32>
    %101 = arith.truncf %100 : vector<8x128xf32> to vector<8x128xbf16>
    %c1_61 = arith.constant 1 : index
    %c0_62 = arith.constant 0 : index
    %c0_63 = arith.constant 0 : index
    %102 = vector.load %arg4[%c1_61, %c0_62, %c0_63] : memref<2x128x128xbf16, #tpu.memory_space<vmem>>, vector<1x128x128xbf16>
    %103 = vector.shape_cast %102 : vector<1x128x128xbf16> to vector<128x128xbf16>
    %cst_64 = arith.constant dense<0.000000e+00> : vector<8x128xf32>
    %104 = tpu.matmul %101, %103, %cst_64 {dimension_numbers = #tpu.dot_dimension_numbers<[1], [0], [0], [1], [0, 0, 1, 1], [], []>} : vector<8x128xbf16>, vector<128x128xbf16>, vector<8x128xf32> -> vector<8x128xf32>
    %105 = arith.truncf %104 : vector<8x128xf32> to vector<8x128xbf16>
    %c1_65 = arith.constant 1 : index
    %c0_66 = arith.constant 0 : index
    %c0_67 = arith.constant 0 : index
    %106 = vector.load %arg5[%c1_65, %c0_66, %c0_67] : memref<2x128x128xbf16, #tpu.memory_space<vmem>>, vector<1x128x128xbf16>
    %107 = vector.shape_cast %106 : vector<1x128x128xbf16> to vector<128x128xbf16>
    %cst_68 = arith.constant dense<0.000000e+00> : vector<8x128xf32>
    %108 = tpu.matmul %105, %107, %cst_68 {dimension_numbers = #tpu.dot_dimension_numbers<[1], [0], [0], [1], [0, 0, 1, 1], [], []>} : vector<8x128xbf16>, vector<128x128xbf16>, vector<8x128xf32> -> vector<8x128xf32>
    %c1_69 = arith.constant 1 : index
    %c0_70 = arith.constant 0 : index
    %c0_71 = arith.constant 0 : index
    %109 = vector.load %arg6[%c1_69, %c0_70, %c0_71] : memref<2x1x128xf32, #tpu.memory_space<vmem>>, vector<1x1x128xf32>
    %110 = vector.shape_cast %109 : vector<1x1x128xf32> to vector<1x128xf32>
    %111 = vector.broadcast %110 : vector<1x128xf32> to vector<8x128xf32>
    %112 = arith.addf %108, %111 : vector<8x128xf32>
    %113 = arith.addf %112, %100 : vector<8x128xf32>
    %c1_72 = arith.constant 1 : index
    %c0_73 = arith.constant 0 : index
    %c0_74 = arith.constant 0 : index
    %114 = vector.load %arg7[%c1_72, %c0_73, %c0_74] : memref<2x1x128xf32, #tpu.memory_space<vmem>>, vector<1x1x128xf32>
    %115 = vector.shape_cast %114 : vector<1x1x128xf32> to vector<1x128xf32>
    %c1_75 = arith.constant 1 : index
    %c0_76 = arith.constant 0 : index
    %c0_77 = arith.constant 0 : index
    %116 = vector.load %arg8[%c1_75, %c0_76, %c0_77] : memref<2x1x128xf32, #tpu.memory_space<vmem>>, vector<1x1x128xf32>
    %117 = vector.shape_cast %116 : vector<1x1x128xf32> to vector<1x128xf32>
    %cst_78 = arith.constant dense<0.000000e+00> : vector<8xf32>
    %118 = vector.multi_reduction <add>, %113, %cst_78 [1] : vector<8x128xf32> to vector<8xf32>
    %119 = vector.shape_cast %118 : vector<8xf32> to vector<8x1xf32>
    %cst_79 = arith.constant 1.280000e+02 : f32
    %120 = vector.broadcast %cst_79 : f32 to vector<8x1xf32>
    %121 = arith.divf %119, %120 : vector<8x1xf32>
    %122 = vector.broadcast %121 : vector<8x1xf32> to vector<8x128xf32>
    %123 = arith.subf %113, %122 : vector<8x128xf32>
    %124 = arith.mulf %123, %123 : vector<8x128xf32>
    %cst_80 = arith.constant dense<0.000000e+00> : vector<8xf32>
    %125 = vector.multi_reduction <add>, %124, %cst_80 [1] : vector<8x128xf32> to vector<8xf32>
    %126 = vector.shape_cast %125 : vector<8xf32> to vector<8x1xf32>
    %cst_81 = arith.constant 1.280000e+02 : f32
    %127 = vector.broadcast %cst_81 : f32 to vector<8x1xf32>
    %128 = arith.divf %126, %127 : vector<8x1xf32>
    %129 = vector.broadcast %121 : vector<8x1xf32> to vector<8x128xf32>
    %130 = arith.subf %113, %129 : vector<8x128xf32>
    %cst_82 = arith.constant 9.99999997E-7 : f32
    %131 = vector.broadcast %cst_82 : f32 to vector<8x1xf32>
    %132 = arith.addf %128, %131 : vector<8x1xf32>
    %133 = math.rsqrt %132 : vector<8x1xf32>
    %134 = vector.broadcast %133 : vector<8x1xf32> to vector<8x128xf32>
    %135 = arith.mulf %130, %134 : vector<8x128xf32>
    %136 = vector.broadcast %115 : vector<1x128xf32> to vector<8x128xf32>
    %137 = arith.mulf %135, %136 : vector<8x128xf32>
    %138 = vector.broadcast %117 : vector<1x128xf32> to vector<8x128xf32>
    %139 = arith.addf %137, %138 : vector<8x128xf32>
    %140 = arith.truncf %139 : vector<8x128xf32> to vector<8x128xbf16>
    %c1_83 = arith.constant 1 : index
    %c0_84 = arith.constant 0 : index
    %c0_85 = arith.constant 0 : index
    %141 = vector.load %arg9[%c1_83, %c0_84, %c0_85] : memref<2x128x128xbf16, #tpu.memory_space<vmem>>, vector<1x128x128xbf16>
    %142 = vector.shape_cast %141 : vector<1x128x128xbf16> to vector<128x128xbf16>
    %cst_86 = arith.constant dense<0.000000e+00> : vector<8x128xf32>
    %143 = tpu.matmul %140, %142, %cst_86 {dimension_numbers = #tpu.dot_dimension_numbers<[1], [0], [0], [1], [0, 0, 1, 1], [], []>} : vector<8x128xbf16>, vector<128x128xbf16>, vector<8x128xf32> -> vector<8x128xf32>
    %c1_87 = arith.constant 1 : index
    %c0_88 = arith.constant 0 : index
    %c0_89 = arith.constant 0 : index
    %144 = vector.load %arg10[%c1_87, %c0_88, %c0_89] : memref<2x1x128xf32, #tpu.memory_space<vmem>>, vector<1x1x128xf32>
    %145 = vector.shape_cast %144 : vector<1x1x128xf32> to vector<1x128xf32>
    %146 = vector.broadcast %145 : vector<1x128xf32> to vector<8x128xf32>
    %147 = arith.addf %143, %146 : vector<8x128xf32>
    %cst_90 = arith.constant 0.000000e+00 : f32
    %148 = vector.broadcast %cst_90 : f32 to vector<8x128xf32>
    %149 = arith.maximumf %147, %148 : vector<8x128xf32>
    %150 = arith.truncf %149 : vector<8x128xf32> to vector<8x128xbf16>
    %c1_91 = arith.constant 1 : index
    %c0_92 = arith.constant 0 : index
    %c0_93 = arith.constant 0 : index
    %151 = vector.load %arg11[%c1_91, %c0_92, %c0_93] : memref<2x128x128xbf16, #tpu.memory_space<vmem>>, vector<1x128x128xbf16>
    %152 = vector.shape_cast %151 : vector<1x128x128xbf16> to vector<128x128xbf16>
    %cst_94 = arith.constant dense<0.000000e+00> : vector<8x128xf32>
    %153 = tpu.matmul %150, %152, %cst_94 {dimension_numbers = #tpu.dot_dimension_numbers<[1], [0], [0], [1], [0, 0, 1, 1], [], []>} : vector<8x128xbf16>, vector<128x128xbf16>, vector<8x128xf32> -> vector<8x128xf32>
    %c1_95 = arith.constant 1 : index
    %c0_96 = arith.constant 0 : index
    %c0_97 = arith.constant 0 : index
    %154 = vector.load %arg12[%c1_95, %c0_96, %c0_97] : memref<2x1x128xf32, #tpu.memory_space<vmem>>, vector<1x1x128xf32>
    %155 = vector.shape_cast %154 : vector<1x1x128xf32> to vector<1x128xf32>
    %156 = vector.broadcast %155 : vector<1x128xf32> to vector<8x128xf32>
    %157 = arith.addf %153, %156 : vector<8x128xf32>
    %158 = arith.addf %157, %139 : vector<8x128xf32>
    %c1_98 = arith.constant 1 : index
    %c0_99 = arith.constant 0 : index
    %c0_100 = arith.constant 0 : index
    %159 = vector.load %arg13[%c1_98, %c0_99, %c0_100] : memref<2x1x128xf32, #tpu.memory_space<vmem>>, vector<1x1x128xf32>
    %160 = vector.shape_cast %159 : vector<1x1x128xf32> to vector<1x128xf32>
    %c1_101 = arith.constant 1 : index
    %c0_102 = arith.constant 0 : index
    %c0_103 = arith.constant 0 : index
    %161 = vector.load %arg14[%c1_101, %c0_102, %c0_103] : memref<2x1x128xf32, #tpu.memory_space<vmem>>, vector<1x1x128xf32>
    %162 = vector.shape_cast %161 : vector<1x1x128xf32> to vector<1x128xf32>
    %cst_104 = arith.constant dense<0.000000e+00> : vector<8xf32>
    %163 = vector.multi_reduction <add>, %158, %cst_104 [1] : vector<8x128xf32> to vector<8xf32>
    %164 = vector.shape_cast %163 : vector<8xf32> to vector<8x1xf32>
    %cst_105 = arith.constant 1.280000e+02 : f32
    %165 = vector.broadcast %cst_105 : f32 to vector<8x1xf32>
    %166 = arith.divf %164, %165 : vector<8x1xf32>
    %167 = vector.broadcast %166 : vector<8x1xf32> to vector<8x128xf32>
    %168 = arith.subf %158, %167 : vector<8x128xf32>
    %169 = arith.mulf %168, %168 : vector<8x128xf32>
    %cst_106 = arith.constant dense<0.000000e+00> : vector<8xf32>
    %170 = vector.multi_reduction <add>, %169, %cst_106 [1] : vector<8x128xf32> to vector<8xf32>
    %171 = vector.shape_cast %170 : vector<8xf32> to vector<8x1xf32>
    %cst_107 = arith.constant 1.280000e+02 : f32
    %172 = vector.broadcast %cst_107 : f32 to vector<8x1xf32>
    %173 = arith.divf %171, %172 : vector<8x1xf32>
    %174 = vector.broadcast %166 : vector<8x1xf32> to vector<8x128xf32>
    %175 = arith.subf %158, %174 : vector<8x128xf32>
    %cst_108 = arith.constant 9.99999997E-7 : f32
    %176 = vector.broadcast %cst_108 : f32 to vector<8x1xf32>
    %177 = arith.addf %173, %176 : vector<8x1xf32>
    %178 = math.rsqrt %177 : vector<8x1xf32>
    %179 = vector.broadcast %178 : vector<8x1xf32> to vector<8x128xf32>
    %180 = arith.mulf %175, %179 : vector<8x128xf32>
    %181 = vector.broadcast %160 : vector<1x128xf32> to vector<8x128xf32>
    %182 = arith.mulf %180, %181 : vector<8x128xf32>
    %183 = vector.broadcast %162 : vector<1x128xf32> to vector<8x128xf32>
    %184 = arith.addf %182, %183 : vector<8x128xf32>
    %185 = arith.mulf %184, %184 : vector<8x128xf32>
    %cst_109 = arith.constant dense<0.000000e+00> : vector<8xf32>
    %186 = vector.multi_reduction <add>, %185, %cst_109 [1] : vector<8x128xf32> to vector<8xf32>
    %187 = vector.shape_cast %186 : vector<8xf32> to vector<8x1xf32>
    %cst_110 = arith.constant 1.000000e-24 : f32
    %188 = vector.broadcast %cst_110 : f32 to vector<8x1xf32>
    %189 = arith.maximumf %187, %188 : vector<8x1xf32>
    %190 = math.rsqrt %189 : vector<8x1xf32>
    %191 = vector.broadcast %190 : vector<8x1xf32> to vector<8x128xf32>
    %192 = arith.mulf %184, %191 : vector<8x128xf32>
    %c0_111 = arith.constant 0 : index
    %c0_112 = arith.constant 0 : index
    %193 = vector.load %arg15[%c0_111, %c0_112] : memref<8x128xf32, #tpu.memory_space<vmem>>, vector<8x128xf32>
    tpu.vector_store %arg15[%c0_111, %c0_112], %192 {strides = array<i32>} : memref<8x128xf32, #tpu.memory_space<vmem>>, vector<8x128xf32>,
    return
  }
  func.func @transform_0(%arg0: i32) -> (i32, i32) {
    %c0_i32 = arith.constant 0 : i32
    %c0_i32_0 = arith.constant 0 : i32
    return %arg0, %c0_i32 : i32, i32
  }
  func.func @transform_1(%arg0: i32) -> (i32, i32, i32) {
    %c0_i32 = arith.constant 0 : i32
    %c0_i32_0 = arith.constant 0 : i32
    %c0_i32_1 = arith.constant 0 : i32
    %c0_i32_2 = arith.constant 0 : i32
    return %c0_i32, %c0_i32_0, %c0_i32_1 : i32, i32, i32
  }
  func.func @transform_2(%arg0: i32) -> (i32, i32, i32) {
    %c0_i32 = arith.constant 0 : i32
    %c0_i32_0 = arith.constant 0 : i32
    %c0_i32_1 = arith.constant 0 : i32
    %c0_i32_2 = arith.constant 0 : i32
    return %c0_i32, %c0_i32_0, %c0_i32_1 : i32, i32, i32
  }
  func.func @transform_3(%arg0: i32) -> (i32, i32, i32) {
    %c0_i32 = arith.constant 0 : i32
    %c0_i32_0 = arith.constant 0 : i32
    %c0_i32_1 = arith.constant 0 : i32
    %c0_i32_2 = arith.constant 0 : i32
    return %c0_i32, %c0_i32_0, %c0_i32_1 : i32, i32, i32
  }
  func.func @transform_4(%arg0: i32) -> (i32, i32, i32) {
    %c0_i32 = arith.constant 0 : i32
    %c0_i32_0 = arith.constant 0 : i32
    %c0_i32_1 = arith.constant 0 : i32
    %c0_i32_2 = arith.constant 0 : i32
    return %c0_i32, %c0_i32_0, %c0_i32_1 : i32, i32, i32
  }
  func.func @transform_5(%arg0: i32) -> (i32, i32, i32) {
    %c0_i32 = arith.constant 0 : i32
    %c0_i32_0 = arith.constant 0 : i32
    %c0_i32_1 = arith.constant 0 : i32
    %c0_i32_2 = arith.constant 0 : i32
    return %c0_i32, %c0_i32_0, %c0_i32_1 : i32, i32, i32
  }
  func.func @transform_6(%arg0: i32) -> (i32, i32, i32) {
    %c0_i32 = arith.constant 0 : i32
    %c0_i32_0 = arith.constant 0 : i32
    %c0_i32_1 = arith.constant 0 : i32
    %c0_i32_2 = arith.constant 0 : i32
    return %c0_i32, %c0_i32_0, %c0_i32_1 : i32, i32, i32
  }
  func.func @transform_7(%arg0: i32) -> (i32, i32, i32) {
    %c0_i32 = arith.constant 0 : i32
    %c0_i32_0 = arith.constant 0 : i32
    %c0_i32_1 = arith.constant 0 : i32
    %c0_i32_2 = arith.constant 0 : i32
    return %c0_i32, %c0_i32_0, %c0_i32_1 : i32, i32, i32
  }
  func.func @transform_8(%arg0: i32) -> (i32, i32, i32) {
    %c0_i32 = arith.constant 0 : i32
    %c0_i32_0 = arith.constant 0 : i32
    %c0_i32_1 = arith.constant 0 : i32
    %c0_i32_2 = arith.constant 0 : i32
    return %c0_i32, %c0_i32_0, %c0_i32_1 : i32, i32, i32
  }
  func.func @transform_9(%arg0: i32) -> (i32, i32, i32) {
    %c0_i32 = arith.constant 0 : i32
    %c0_i32_0 = arith.constant 0 : i32
    %c0_i32_1 = arith.constant 0 : i32
    %c0_i32_2 = arith.constant 0 : i32
    return %c0_i32, %c0_i32_0, %c0_i32_1 : i32, i32, i32
  }
  func.func @transform_10(%arg0: i32) -> (i32, i32, i32) {
    %c0_i32 = arith.constant 0 : i32
    %c0_i32_0 = arith.constant 0 : i32
    %c0_i32_1 = arith.constant 0 : i32
    %c0_i32_2 = arith.constant 0 : i32
    return %c0_i32, %c0_i32_0, %c0_i32_1 : i32, i32, i32
  }
  func.func @transform_11(%arg0: i32) -> (i32, i32, i32) {
    %c0_i32 = arith.constant 0 : i32
    %c0_i32_0 = arith.constant 0 : i32
    %c0_i32_1 = arith.constant 0 : i32
    %c0_i32_2 = arith.constant 0 : i32
    return %c0_i32, %c0_i32_0, %c0_i32_1 : i32, i32, i32
  }
  func.func @transform_12(%arg0: i32) -> (i32, i32, i32) {
    %c0_i32 = arith.constant 0 : i32
    %c0_i32_0 = arith.constant 0 : i32
    %c0_i32_1 = arith.constant 0 : i32
    %c0_i32_2 = arith.constant 0 : i32
    return %c0_i32, %c0_i32_0, %c0_i32_1 : i32, i32, i32
  }
  func.func @transform_13(%arg0: i32) -> (i32, i32, i32) {
    %c0_i32 = arith.constant 0 : i32
    %c0_i32_0 = arith.constant 0 : i32
    %c0_i32_1 = arith.constant 0 : i32
    %c0_i32_2 = arith.constant 0 : i32
    return %c0_i32, %c0_i32_0, %c0_i32_1 : i32, i32, i32
  }
  func.func @transform_14(%arg0: i32) -> (i32, i32) {
    %c0_i32 = arith.constant 0 : i32
    %c0_i32_0 = arith.constant 0 : i32
    return %arg0, %c0_i32 : i32, i32
  }
}

</mosaic_0001>

<bundles_post_ra>
// kernel: tpu_custom_call.1
= control target key start
LH: loop header
LB: loop body
LE: loop exit
PB: predicated region body
PF: predicated region fallthrough
CT: control target
= control target key end

     0   :  { %19 = vsyncpa [#allocation3], 0  ;;  %s2381_s0 = inlined_call_operand.hbm [shape: f32[8,128], index: 0, kind: input, shape index: {}]   ;;  %s2382_s1 = inlined_call_operand.hbm [shape: bf16[2,128,128], index: 1, kind: input, shape index: {}]   ;;  %s2383_s2 = inlined_call_operand.vmem [shape: f32[2,1,128], index: 2, kind: input, shape index: {}]   ;;  %s2384_s3 = inlined_call_operand.hbm [shape: bf16[2,128,128], index: 3, kind: input, shape index: {}]   ;;  %s2385_s4 = inlined_call_operand.hbm [shape: bf16[2,128,128], index: 4, kind: input, shape index: {}]   ;;  %s2386_s5 = inlined_call_operand.vmem [shape: f32[2,1,128], index: 5, kind: input, shape index: {}]   ;;  %s2387_s6 = inlined_call_operand.vmem [shape: f32[2,1,128], index: 6, kind: input, shape index: {}]   ;;  %s2388_s7 = inlined_call_operand.vmem [shape: f32[2,1,128], index: 7, kind: input, shape index: {}]   ;;  %s2389_s8 = inlined_call_operand.hbm [shape: bf16[2,128,128], index: 8, kind: input, shape index: {}]   ;;  %s2390_s9 = inlined_call_operand.vmem [shape: f32[2,1,128], index: 9, kind: input, shape index: {}]   ;;  %s2391_s10 = inlined_call_operand.hbm [shape: bf16[2,128,128], index: 10, kind: input, shape index: {}]   ;;  %s2392_s11 = inlined_call_operand.vmem [shape: f32[2,1,128], index: 11, kind: input, shape index: {}]   ;;  %s2393_s12 = inlined_call_operand.vmem [shape: f32[2,1,128], index: 12, kind: input, shape index: {}]   ;;  %s2394_s13 = inlined_call_operand.vmem [shape: f32[2,1,128], index: 13, kind: input, shape index: {}]   ;;  %s2395_s14 = inlined_call_operand.hbm [shape: f32[8,128], index: 14, kind: output, shape index: {}]  }
   0x1   :  { %20 = vsyncpa [#allocation6], 0 }
   0x2   :  { %21 = vsyncpa [#allocation9], 0 }
   0x3   :  { %22 = vsyncpa [#allocation12], 0 }
   0x4   :  { %23 = vsyncpa [#allocation4], 0  ;;  %s2048_s29 = smov [#allocation5]   ;;  %s1884_s17 = scalar_lea.hbm %s2382_s1, 2048 }
   0x5   :  { %s39_s30 = sshll.u32 %s2048_s29, 4  ;;  %p1885_p0 = scmp.ne.s32.totalorder %s2382_s1, %s1884_s17  ;;  %s40_s30 = int_to_ptr.vmem [resolvable:$true] %s39_s30 }
   0x6   :  { %p1888_p1 = scmp.lt.u32.totalorder %s1884_s17, %s2382_s1 }
   0x8   :  { %p1890_p2 = pnand %p1888_p1, %p1885_p0 }
   0xa   :  { %1893 = shalt.err (!%p1890_p2)
}
   0xb   :  { %s1894_s22 = scalar_lea.vmem %s40_s30, 2048  ;;  %p1899_p4 = scmp.lt.s32.totalorder %s40_s30, %s40_s30 }
   0xc   :  { %p1895_p3 = scmp.ne.s32.totalorder %s40_s30, %s1894_s22  ;;  %p1900_p5 = scmp.lt.s32.totalorder %s1894_s22, %s1894_s22 }
   0xe   :  { %p1901_p6 = por %p1900_p5, %p1899_p4 }
  0x10   :  { %p1902_p7 = pnand %p1901_p6, %p1895_p3 }
  0x12   :  { %1905 = shalt.err (!%p1902_p7)
}
  0x13   :  { %s2049_s23 = smov 64   ;;  %s2050_s24 = smov 4  }
  0x14   :  { %45 = dma.hbm_to_vmem [thread:$0]  %s2382_s1, 2048, %s40_s30, [#allocation6], %s2049_s23, %s2049_s23, %s2050_s24  }
  0x15   :  { %s2051_s27 = smov [#allocation8]   ;;  %s2052_s29 = smov [#allocation2]  }
  0x16   :  { %s65_s28 = sshll.u32 %s2051_s27, 4  ;;  %s30_s15 = sshll.u32 %s2052_s29, 4  ;;  %s66_s28 = int_to_ptr.vmem [resolvable:$true] %s65_s28  ;;  %s31_s15 = int_to_ptr.vmem [resolvable:$true] %s30_s15 }
  0x17   :  { %s1906_s18 = scalar_lea.hbm %s2385_s4, 2048 }
  0x18   :  { %p1907_p8 = scmp.ne.s32.totalorder %s2385_s4, %s1906_s18  ;;  %p1910_p9 = scmp.lt.u32.totalorder %s1906_s18, %s2385_s4 }
  0x1a   :  { %p1912_p10 = pnand %p1910_p9, %p1907_p8 }
  0x1c   :  { %1915 = shalt.err (!%p1912_p10)
}
  0x1d   :  { %s1916_s1 = scalar_lea.vmem %s66_s28, 2048  ;;  %p1921_p12 = scmp.lt.s32.totalorder %s66_s28, %s66_s28 }
  0x1e   :  { %p1917_p11 = scmp.ne.s32.totalorder %s66_s28, %s1916_s1  ;;  %p1922_p13 = scmp.lt.s32.totalorder %s1916_s1, %s1916_s1 }
  0x20   :  { %p1923_p0 = por %p1922_p13, %p1921_p12 }
  0x22   :  { %p1924_p1 = pnand %p1923_p0, %p1917_p11 }
  0x24   :  { %1927 = shalt.err (!%p1924_p1)
}
  0x25   :  { %71 = dma.hbm_to_vmem [thread:$0]  %s2385_s4, 2048, %s66_s28, [#allocation9], %s2049_s23, %s2049_s23, %s2050_s24  }
  0x26   :  { %s1928_s29 = scalar_lea.hbm %s2381_s0, 128 }
  0x27   :  { %p1929_p2 = scmp.ne.s32.totalorder %s2381_s0, %s1928_s29  ;;  %p1932_p3 = scmp.lt.u32.totalorder %s1928_s29, %s2381_s0 }
  0x29   :  { %p1934_p4 = pnand %p1932_p3, %p1929_p2 }
  0x2b   :  { %1937 = shalt.err (!%p1934_p4)
}
  0x2c   :  { %s1938_s20 = scalar_lea.vmem %s31_s15, 128  ;;  %p1943_p6 = scmp.lt.s32.totalorder %s31_s15, %s31_s15 }
  0x2d   :  { %p1939_p5 = scmp.ne.s32.totalorder %s31_s15, %s1938_s20  ;;  %p1944_p7 = scmp.lt.s32.totalorder %s1938_s20, %s1938_s20 }
  0x2f   :  { %p1945_p8 = por %p1944_p7, %p1943_p6 }
  0x31   :  { %p1946_p9 = pnand %p1945_p8, %p1939_p5 }
  0x33   :  { %1949 = shalt.err (!%p1946_p9)
}
  0x34   :  { %33 = dma.hbm_to_vmem [thread:$0]  %s2381_s0, 128, %s31_s15, [#allocation3]  }
  0x35   :  { %s2053_s21 = smov [#allocation7]   ;;  %s2054_s1 = smov [#allocation10]  }
  0x36   :  { %s53_s22 = sshll.u32 %s2053_s21, 4  ;;  %s83_s30 = sshll.u32 %s2054_s1, 4  ;;  %s54_s22 = int_to_ptr.vmem [resolvable:$true] %s53_s22  ;;  %s84_s30 = int_to_ptr.vmem [resolvable:$true] %s83_s30 }
  0x37   :  { %s1950_s27 = scalar_lea.hbm %s2384_s3, 2048 }
  0x38   :  { %p1951_p10 = scmp.ne.s32.totalorder %s2384_s3, %s1950_s27  ;;  %p1954_p11 = scmp.lt.u32.totalorder %s1950_s27, %s2384_s3 }
  0x3a   :  { %p1956_p12 = pnand %p1954_p11, %p1951_p10 }
  0x3c   :  { %1959 = shalt.err (!%p1956_p12)
}
  0x3d   :  { %s1960_s0 = scalar_lea.vmem %s54_s22, 2048  ;;  %p1965_p0 = scmp.lt.s32.totalorder %s54_s22, %s54_s22 }
  0x3e   :  { %p1961_p13 = scmp.ne.s32.totalorder %s54_s22, %s1960_s0  ;;  %p1966_p1 = scmp.lt.s32.totalorder %s1960_s0, %s1960_s0 }
  0x40   :  { %p1967_p2 = por %p1966_p1, %p1965_p0 }
  0x42   :  { %p1968_p3 = pnand %p1967_p2, %p1961_p13 }
  0x44   :  { %1971 = shalt.err (!%p1968_p3)
}
  0x45   :  { %59 = dma.hbm_to_vmem [thread:$0]  %s2384_s3, 2048, %s54_s22, [#allocation6], %s2049_s23, %s2049_s23, %s2050_s24  }
  0x46   :  { %s1972_s28 = scalar_lea.hbm %s2389_s8, 2048 }
  0x47   :  { %p1973_p4 = scmp.ne.s32.totalorder %s2389_s8, %s1972_s28  ;;  %p1976_p5 = scmp.lt.u32.totalorder %s1972_s28, %s2389_s8 }
  0x49   :  { %p1978_p6 = pnand %p1976_p5, %p1973_p4 }
  0x4b   :  { %1981 = shalt.err (!%p1978_p6)
}
  0x4c   :  { %s1982_s27 = scalar_lea.vmem %s84_s30, 2048  ;;  %p1987_p8 = scmp.lt.s32.totalorder %s84_s30, %s84_s30 }
  0x4d   :  { %p1983_p7 = scmp.ne.s32.totalorder %s84_s30, %s1982_s27  ;;  %p1988_p9 = scmp.lt.s32.totalorder %s1982_s27, %s1982_s27 }
  0x4f   :  { %p1989_p10 = por %p1988_p9, %p1987_p8 }
  0x51   :  { %p1990_p11 = pnand %p1989_p10, %p1983_p7 }
  0x53   :  { %1993 = shalt.err (!%p1990_p11)
}
  0x54   :  { %89 = dma.hbm_to_vmem [thread:$0]  %s2389_s8, 2048, %s84_s30, [#allocation9], %s2049_s23, %s2049_s23, %s2050_s24  }
  0x55   :  { %s2055_s29 = smov [#allocation11]   ;;  %s1994_s0 = scalar_lea.hbm %s2391_s10, 2048 }
  0x56   :  { %s97_s16 = sshll.u32 %s2055_s29, 4  ;;  %p1995_p12 = scmp.ne.s32.totalorder %s2391_s10, %s1994_s0  ;;  %s98_s16 = int_to_ptr.vmem [resolvable:$true] %s97_s16 }
  0x57   :  { %p1998_p13 = scmp.lt.u32.totalorder %s1994_s0, %s2391_s10 }
  0x59   :  { %p2000_p0 = pnand %p1998_p13, %p1995_p12 }
  0x5b   :  { %2003 = shalt.err (!%p2000_p0)
}
  0x5c   :  { %s2004_s28 = scalar_lea.vmem %s98_s16, 2048  ;;  %p2009_p2 = scmp.lt.s32.totalorder %s98_s16, %s98_s16 }
  0x5d   :  { %p2005_p1 = scmp.ne.s32.totalorder %s98_s16, %s2004_s28  ;;  %p2010_p3 = scmp.lt.s32.totalorder %s2004_s28, %s2004_s28 }
  0x5f   :  { %p2011_p4 = por %p2010_p3, %p2009_p2 }
  0x61   :  { %p2012_p5 = pnand %p2011_p4, %p2005_p1 }
  0x63   :  { %2015 = shalt.err (!%p2012_p5)
}
  0x64   :  { %103 = dma.hbm_to_vmem [thread:$0]  %s2391_s10, 2048, %s98_s16, [#allocation12], %s2049_s23, %s2049_s23, %s2050_s24  }
  0x65   :  { %2038 = dma.done.wait [#allocation3], 128  }
  0x66   :  { %2039 = vsyncadd [#allocation3], 4294967168 }
  0x67   :  { %2040 = dma.done.wait [#allocation6], 4096  }
  0x68   :  { %2041 = vsyncadd [#allocation6], 4294963200 }
  0x69   :  { %2042 = dma.done.wait [#allocation9], 4096  }
  0x6a   :  { %2043 = vsyncadd [#allocation9], 4294963200 }
  0x6b   :  { %2044 = dma.done.wait [#allocation12], 2048  }
  0x6c   :  { %2045 = vsyncadd [#allocation12], 4294965248  ;;  %v2056_v0 = vmov 0.0   ;;  %vm2057_vm0 = vmmov 0   ;;  %v1794_v1 = vld [vmem:[#allocation5] sm:$0xff]   ;;  %v1795_v2 = vld [vmem:[#allocation5 + $0x8] sm:$0xff]  }
  0x6d   :  { %1583 = vmatprep.subr.bf16.mxu0 %v2056_v0  ;;  %1599 = vmatprep.mubr.msk.bf16.mxu0 %vm2057_vm0, %v2056_v0  ;;  %v1796_v3 = vld [vmem:[#allocation5 + $0x10] sm:$0xff]   ;;  %v1802_v4 = vld [vmem:[#allocation5 + $0x40] sm:$0xff]   ;;  %v1797_v5 = vld [vmem:[#allocation5 + $0x18] sm:$0xff]  }
  0x6e   :  { %1603 = vmatprep.subr.bf16.mxu1 %v2056_v0  ;;  %1619 = vmatprep.mubr.msk.bf16.mxu1 %vm2057_vm0, %v2056_v0  ;;  %v1803_v6 = vld [vmem:[#allocation5 + $0x48] sm:$0xff]   ;;  %v1798_v7 = vld [vmem:[#allocation5 + $0x20] sm:$0xff]   ;;  %v1804_v8 = vld [vmem:[#allocation5 + $0x50] sm:$0xff]  }
  0x6f   :  { %1584 = vmatpush3.bf16.msra.mxu0 %v1794_v1  ;;  %1604 = vmatpush3.bf16.msra.mxu1 %v1802_v4  ;;  %v1799_v9 = vld [vmem:[#allocation5 + $0x28] sm:$0xff]   ;;  %v1805_v10 = vld [vmem:[#allocation5 + $0x58] sm:$0xff]   ;;  %v1800_v11 = vld [vmem:[#allocation5 + $0x30] sm:$0xff]  }
  0x70   :  { %1585 = vmatprep.subr.bf16.mxu0 %v2056_v0  ;;  %1605 = vmatprep.subr.bf16.mxu1 %v2056_v0  ;;  %v1806_v12 = vld [vmem:[#allocation5 + $0x60] sm:$0xff]   ;;  %v1801_v13 = vld [vmem:[#allocation5 + $0x38] sm:$0xff]   ;;  %v1807_v15 = vld [vmem:[#allocation5 + $0x68] sm:$0xff]  }
  0x71   :  { %v129_v14 = vld [vmem:[#allocation2] sm:$0xff]  ;;  %v1808_v17 = vld [vmem:[#allocation5 + $0x70] sm:$0xff]   ;;  %v1810_v19 = vld [vmem:[#allocation7] sm:$0xff]  }
  0x72   :  { %v130_v16 = vpack.c.bf16 %v129_v14, %v129_v14  ;;  %v1809_v18 = vld [vmem:[#allocation5 + $0x78] sm:$0xff]   ;;  %v1811_v20 = vld [vmem:[#allocation7 + $0x8] sm:$0xff]   ;;  %v1812_v21 = vld [vmem:[#allocation7 + $0x10] sm:$0xff]  }
  0x73   :  { %1586 = vmatpush3.bf16.msra.mxu0 %v1795_v2  ;;  %1606 = vmatpush3.bf16.msra.mxu1 %v1803_v6  ;;  %v1813_v22 = vld [vmem:[#allocation7 + $0x18] sm:$0xff]   ;;  %v1814_v23 = vld [vmem:[#allocation7 + $0x20] sm:$0xff]   ;;  %v1815_v24 = vld [vmem:[#allocation7 + $0x28] sm:$0xff]  }
  0x74   :  { %1587 = vmatprep.subr.bf16.mxu0 %v2056_v0  ;;  %1607 = vmatprep.subr.bf16.mxu1 %v2056_v0  ;;  %v1816_v25 = vld [vmem:[#allocation7 + $0x30] sm:$0xff]   ;;  %v1389_v26 = vld [vmem:[%s2383_s2] ss:$0 sm:$0xff]  ;;  %v1818_v34 = vld [vmem:[#allocation8] sm:$0xff]  }
  0x75   :  { %v1817_v33 = vld [vmem:[#allocation7 + $0x38] sm:$0xff]   ;;  %v1819_v35 = vld [vmem:[#allocation8 + $0x8] sm:$0xff]   ;;  %v1820_v36 = vld [vmem:[#allocation8 + $0x10] sm:$0xff]  }
  0x76   :  { %v1821_v37 = vld [vmem:[#allocation8 + $0x18] sm:$0xff]   ;;  %v1822_v38 = vld [vmem:[#allocation8 + $0x20] sm:$0xff]   ;;  %v1823_v39 = vld [vmem:[#allocation8 + $0x28] sm:$0xff]  }
  0x77   :  { %1588 = vmatpush3.bf16.msra.mxu0 %v1796_v3  ;;  %1608 = vmatpush3.bf16.msra.mxu1 %v1804_v8  ;;  %v1824_v40 = vld [vmem:[#allocation8 + $0x30] sm:$0xff]   ;;  %v1399_v41 = vld [vmem:[%s2383_s2 + $0x1] ss:$0 sm:$0xff]  ;;  %v1416_v54 = vld [vmem:[%s2386_s5] ss:$0 sm:$0xff]  ;;  %s2058_s2 = smov [#allocation13]  }
  0x78   :  { %1589 = vmatprep.subr.bf16.mxu0 %v2056_v0  ;;  %1609 = vmatprep.subr.bf16.mxu1 %v2056_v0  ;;  %v1825_v48 = vld [vmem:[#allocation8 + $0x38] sm:$0xff]   ;;  %v1826_v61 = vld [vmem:[#allocation10] sm:$0xff]   ;;  %v1827_v62 = vld [vmem:[#allocation10 + $0x8] sm:$0xff]   ;;  %s1377_s1 = sshll.u32 %s2058_s2, 4  ;;  %s1378_s1 = int_to_ptr.vmem [resolvable:$true] %s1377_s1 }
  0x79   :  { %v1828_v4 = vld [vmem:[#allocation10 + $0x10] sm:$0xff]   ;;  %v1830_v6 = vld [vmem:[#allocation10 + $0x20] sm:$0xff]   ;;  %s2016_s25 = scalar_lea.vmem %s1378_s1, 128  ;;  %p2021_p7 = scmp.lt.s32.totalorder %s1378_s1, %s1378_s1 }
  0x7a   :  { %v1832_v8 = vld [vmem:[#allocation10 + $0x30] sm:$0xff]   ;;  %v1838_v14 = vld [vmem:[#allocation11 + $0x20] sm:$0xff]   ;;  %p2017_p6 = scmp.ne.s32.totalorder %s1378_s1, %s2016_s25  ;;  %p2022_p8 = scmp.lt.s32.totalorder %s2016_s25, %s2016_s25 }
  0x7b   :  { %1590 = vmatpush3.bf16.msra.mxu0 %v1797_v5  ;;  %1610 = vmatpush3.bf16.msra.mxu1 %v1805_v10  ;;  %v1829_v5 = vld [vmem:[#allocation10 + $0x18] sm:$0xff]   ;;  %v1834_v10 = vld [vmem:[#allocation11] sm:$0xff]  }
  0x7c   :  { %1591 = vmatprep.subr.bf16.mxu0 %v2056_v0  ;;  %1611 = vmatprep.subr.bf16.mxu1 %v2056_v0  ;;  %p2023_p9 = por %p2022_p8, %p2021_p7 }
  0x7e   :  { %p2024_p10 = pnand %p2023_p9, %p2017_p6 }
  0x7f   :  { %1592 = vmatpush3.bf16.msra.mxu0 %v1798_v7  ;;  %1612 = vmatpush3.bf16.msra.mxu1 %v1806_v12  ;;  %v1831_v7 = vld [vmem:[#allocation10 + $0x28] sm:$0xff]   ;;  %v1836_v12 = vld [vmem:[#allocation11 + $0x10] sm:$0xff]  }
  0x80   :  { %1593 = vmatprep.subr.bf16.mxu0 %v2056_v0  ;;  %1613 = vmatprep.subr.bf16.mxu1 %v2056_v0 }
  0x83   :  { %1594 = vmatpush3.bf16.msra.mxu0 %v1799_v9  ;;  %1614 = vmatpush3.bf16.msra.mxu1 %v1807_v15  ;;  %v1833_v9 = vld [vmem:[#allocation10 + $0x38] sm:$0xff]   ;;  %v1839_v15 = vld [vmem:[#allocation11 + $0x28] sm:$0xff]  }
  0x84   :  { %1595 = vmatprep.subr.bf16.mxu0 %v2056_v0  ;;  %1615 = vmatprep.subr.bf16.mxu1 %v2056_v0 }
  0x87   :  { %1596 = vmatpush3.bf16.msra.mxu0 %v1800_v11  ;;  %1616 = vmatpush3.bf16.msra.mxu1 %v1808_v17  ;;  %v1835_v11 = vld [vmem:[#allocation11 + $0x8] sm:$0xff]  }
  0x88   :  { %1597 = vmatprep.subr.bf16.mxu0 %v2056_v0  ;;  %1617 = vmatprep.subr.bf16.mxu1 %v2056_v0 }
  0x8b   :  { %1598 = vmatpush3.bf16.msra.mxu0 %v1801_v13  ;;  %1618 = vmatpush3.bf16.msra.mxu1 %v1809_v18  ;;  %v1837_v13 = vld [vmem:[#allocation11 + $0x18] sm:$0xff]  }
  0x8c   :  { %1623 = vmatprep.subr.bf16.mxu0 %v2056_v0  ;;  %1643 = vmatprep.subr.bf16.mxu1 %v2056_v0 }
  0x8e   :  { %1600 = vmatmul.mubr.bf16.vlgmr.msra.gmra.mrb[0].mxu0 %v130_v16 }
  0x8f   :  { %1639 = vmatprep.mubr.msk.bf16.mxu0 %vm2057_vm0, %v2056_v0  ;;  %1624 = vmatpush3.bf16.msra.mxu0 %v1810_v19 }
  0x90   :  { %1625 = vmatprep.subr.bf16.mxu0 %v2056_v0 }
  0x93   :  { %1626 = vmatpush3.bf16.msra.mxu0 %v1811_v20  ;;  %v1425_v20 = vld [vmem:[%s2387_s6] ss:$0 sm:$0xff] }
  0x94   :  { %1627 = vmatprep.subr.bf16.mxu0 %v2056_v0 }
  0x97   :  { %1628 = vmatpush3.bf16.msra.mxu0 %v1812_v21 }
  0x98   :  { %1629 = vmatprep.subr.bf16.mxu0 %v2056_v0 }
  0x9b   :  { %1630 = vmatpush3.bf16.msra.mxu0 %v1813_v22  ;;  %v1426_v22 = vld [vmem:[%s2388_s7] ss:$0 sm:$0xff] }
  0x9c   :  { %1631 = vmatprep.subr.bf16.mxu0 %v2056_v0 }
  0x9f   :  { %1632 = vmatpush3.bf16.msra.mxu0 %v1814_v23 }
  0xa0   :  { %1633 = vmatprep.subr.bf16.mxu0 %v2056_v0 }
  0xa3   :  { %1634 = vmatpush3.bf16.msra.mxu0 %v1815_v24 }
  0xa4   :  { %1635 = vmatprep.subr.bf16.mxu0 %v2056_v0 }
  0xa7   :  { %1636 = vmatpush3.bf16.msra.mxu0 %v1816_v25 }
  0xa8   :  { %1637 = vmatprep.subr.bf16.mxu0 %v2056_v0 }
  0xab   :  { %1638 = vmatpush3.bf16.msra.mxu0 %v1817_v33 }
  0xac   :  { %1663 = vmatprep.subr.bf16.mxu0 %v2056_v0 }
 0x161   :  { %v236_v27 = vpop.f32.mrb[0].mxu0 }
 0x162   :  { %v237_v28 = vadd.f32 %v1389_v26, %v236_v27  ;;  %v1601_v29 = vpop.f32.mrb[1].mxu0  ;;  %v1840_v26 = vld [vmem:[#allocation11 + $0x30] sm:$0xff]   ;;  %v1841_v27 = vld [vmem:[#allocation11 + $0x38] sm:$0xff]  }
 0x163   :  { %v239_v30 = vpop.f32.mrb[2].mxu0 }
 0x164   :  { %v242_v31 = vpack.c.bf16 %v237_v28, %v237_v28  ;;  %v1602_v32 = vpop.f32.mrb[3].mxu0  ;;  %v1427_v28 = vld [vmem:[%s2390_s9] ss:$0 sm:$0xff] }
 0x166   :  { %1620 = vmatmul.mubr.bf16.vlgmr.msra.gmra.mrb[0].mxu1 %v242_v31 }
 0x167   :  { %1659 = vmatprep.mubr.msk.bf16.mxu1 %vm2057_vm0, %v2056_v0  ;;  %1644 = vmatpush3.bf16.msra.mxu1 %v1818_v34 }
 0x168   :  { %1645 = vmatprep.subr.bf16.mxu1 %v2056_v0 }
 0x16b   :  { %1646 = vmatpush3.bf16.msra.mxu1 %v1819_v35 }
 0x16c   :  { %1647 = vmatprep.subr.bf16.mxu1 %v2056_v0 }
 0x16f   :  { %1648 = vmatpush3.bf16.msra.mxu1 %v1820_v36  ;;  %v1436_v36 = vld [vmem:[%s2392_s11] ss:$0 sm:$0xff] }
 0x170   :  { %1649 = vmatprep.subr.bf16.mxu1 %v2056_v0 }
 0x173   :  { %1650 = vmatpush3.bf16.msra.mxu1 %v1821_v37 }
 0x174   :  { %1651 = vmatprep.subr.bf16.mxu1 %v2056_v0 }
 0x177   :  { %1652 = vmatpush3.bf16.msra.mxu1 %v1822_v38 }
 0x178   :  { %1653 = vmatprep.subr.bf16.mxu1 %v2056_v0 }
 0x17b   :  { %1654 = vmatpush3.bf16.msra.mxu1 %v1823_v39 }
 0x17c   :  { %1655 = vmatprep.subr.bf16.mxu1 %v2056_v0 }
 0x17f   :  { %1656 = vmatpush3.bf16.msra.mxu1 %v1824_v40 }
 0x180   :  { %1657 = vmatprep.subr.bf16.mxu1 %v2056_v0 }
 0x183   :  { %1658 = vmatpush3.bf16.msra.mxu1 %v1825_v48 }
 0x184   :  { %1683 = vmatprep.subr.bf16.mxu1 %v2056_v0 }
 0x239   :  { %v350_v42 = vpop.f32.mrb[0].mxu1 }
 0x23a   :  { %v351_v43 = vadd.f32 %v1399_v41, %v350_v42  ;;  %v1621_v44 = vpop.f32.mrb[1].mxu1 }
 0x23b   :  { %v353_v45 = vpop.f32.mrb[2].mxu1  ;;  %v1843_v44 = vld [vmem:[#allocation7 + $0x48] sm:$0xff]  }
 0x23c   :  { %v356_v46 = vpack.c.bf16 %v351_v43, %v351_v43  ;;  %v1622_v47 = vpop.f32.mrb[3].mxu1 }
 0x23e   :  { %1640 = vmatmul.mubr.bf16.vlgmr.msra.gmra.mrb[4].mxu0 %v356_v46 }
 0x23f   :  { %1679 = vmatprep.mubr.msk.bf16.mxu0 %vm2057_vm0, %v2056_v0  ;;  %1664 = vmatpush3.bf16.msra.mxu0 %v1826_v61  ;;  %v1856_v61 = vld [vmem:[#allocation8 + $0x70] sm:$0xff]  }
 0x240   :  { %1665 = vmatprep.subr.bf16.mxu0 %v2056_v0 }
 0x243   :  { %1666 = vmatpush3.bf16.msra.mxu0 %v1827_v62 }
 0x244   :  { %1667 = vmatprep.subr.bf16.mxu0 %v2056_v0 }
 0x247   :  { %1668 = vmatpush3.bf16.msra.mxu0 %v1828_v4 }
 0x248   :  { %1669 = vmatprep.subr.bf16.mxu0 %v2056_v0 }
 0x24b   :  { %1670 = vmatpush3.bf16.msra.mxu0 %v1829_v5  ;;  %v1446_v5 = vld [vmem:[%s2394_s13] ss:$0 sm:$0xff] }
 0x24c   :  { %1671 = vmatprep.subr.bf16.mxu0 %v2056_v0 }
 0x24f   :  { %1672 = vmatpush3.bf16.msra.mxu0 %v1830_v6 }
 0x250   :  { %1673 = vmatprep.subr.bf16.mxu0 %v2056_v0 }
 0x253   :  { %1674 = vmatpush3.bf16.msra.mxu0 %v1831_v7 }
 0x254   :  { %1675 = vmatprep.subr.bf16.mxu0 %v2056_v0 }
 0x257   :  { %1676 = vmatpush3.bf16.msra.mxu0 %v1832_v8 }
 0x258   :  { %1677 = vmatprep.subr.bf16.mxu0 %v2056_v0 }
 0x25b   :  { %1678 = vmatpush3.bf16.msra.mxu0 %v1833_v9  ;;  %v1857_v9 = vld [vmem:[#allocation8 + $0x78] sm:$0xff]  }
 0x25c   :  { %1703 = vmatprep.subr.bf16.mxu0 %v2056_v0 }
 0x311   :  { %v455_v49 = vpop.f32.mrb[4].mxu0 }
 0x312   :  { %v461_v50 = vpack.c.bf16 %v455_v49, %v455_v49  ;;  %v1641_v51 = vpop.f32.mrb[5].mxu0  ;;  %v1844_v49 = vld [vmem:[#allocation7 + $0x50] sm:$0xff]  }
 0x313   :  { %v458_v52 = vpop.f32.mrb[6].mxu0  ;;  %v1846_v51 = vld [vmem:[#allocation7 + $0x60] sm:$0xff]  }
 0x314   :  { %v1642_v53 = vpop.f32.mrb[7].mxu0  ;;  %1660 = vmatmul.mubr.bf16.vlgmr.msra.gmra.mrb[4].mxu1 %v461_v50  ;;  %v1845_v50 = vld [vmem:[#allocation7 + $0x58] sm:$0xff]   ;;  %v1847_v52 = vld [vmem:[#allocation7 + $0x68] sm:$0xff]  }
 0x315   :  { %1699 = vmatprep.mubr.msk.bf16.mxu1 %vm2057_vm0, %v2056_v0  ;;  %1684 = vmatpush3.bf16.msra.mxu1 %v1834_v10  ;;  %v1848_v53 = vld [vmem:[#allocation7 + $0x70] sm:$0xff]  }
 0x316   :  { %1685 = vmatprep.subr.bf16.mxu1 %v2056_v0 }
 0x319   :  { %1686 = vmatpush3.bf16.msra.mxu1 %v1835_v11 }
 0x31a   :  { %1687 = vmatprep.subr.bf16.mxu1 %v2056_v0 }
 0x31d   :  { %1688 = vmatpush3.bf16.msra.mxu1 %v1836_v12 }
 0x31e   :  { %1689 = vmatprep.subr.bf16.mxu1 %v2056_v0 }
 0x321   :  { %1690 = vmatpush3.bf16.msra.mxu1 %v1837_v13 }
 0x322   :  { %1691 = vmatprep.subr.bf16.mxu1 %v2056_v0 }
 0x325   :  { %1692 = vmatpush3.bf16.msra.mxu1 %v1838_v14 }
 0x326   :  { %1693 = vmatprep.subr.bf16.mxu1 %v2056_v0 }
 0x329   :  { %1694 = vmatpush3.bf16.msra.mxu1 %v1839_v15  ;;  %v1456_v15 = vld [vmem:[%s2386_s5 + $0x1] ss:$0 sm:$0xff] }
 0x32a   :  { %1695 = vmatprep.subr.bf16.mxu1 %v2056_v0 }
 0x32d   :  { %1696 = vmatpush3.bf16.msra.mxu1 %v1840_v26 }
 0x32e   :  { %1697 = vmatprep.subr.bf16.mxu1 %v2056_v0 }
 0x331   :  { %1698 = vmatpush3.bf16.msra.mxu1 %v1841_v27 }
 0x332   :  { %1723 = vmatprep.subr.bf16.mxu1 %v2056_v0 }
 0x3e7   :  { %v567_v55 = vpop.f32.mrb[4].mxu1 }
 0x3e8   :  { %v568_v56 = vadd.f32 %v1416_v54, %v567_v55  ;;  %v1661_v57 = vpop.f32.mrb[5].mxu1  ;;  %v1849_v54 = vld [vmem:[#allocation7 + $0x78] sm:$0xff]   ;;  %v1850_v55 = vld [vmem:[#allocation8 + $0x40] sm:$0xff]  }
 0x3e9   :  { %v570_v58 = vpop.f32.mrb[6].mxu1  ;;  %v1852_v57 = vld [vmem:[#allocation8 + $0x50] sm:$0xff]  }
 0x3ea   :  { %v1662_v59 = vpop.f32.mrb[7].mxu1  ;;  %v573_v60 = vadd.f32 %v568_v56, %v351_v43  ;;  %v1842_v43 = vld [vmem:[#allocation7 + $0x40] sm:$0xff]   ;;  %v1851_v56 = vld [vmem:[#allocation8 + $0x48] sm:$0xff]   ;;  %v1853_v58 = vld [vmem:[#allocation8 + $0x58] sm:$0xff]  }
 0x3eb   :  { %v1854_v59 = vld [vmem:[#allocation8 + $0x60] sm:$0xff]  }
 0x3ec   :  { %576 = vadd.xlane.f32.xlu0 %v573_v60 }
 0x479   :  { %v577_v63 = vpop.xlane.xlu0 %576 }
 0x47a   :  { %v579_v1 = vmul.f32 0.0078125, %v577_v63 }
 0x47c   :  { %v580_v2 = vsub.f32 %v573_v60, %v579_v1  ;;  %v1855_v60 = vld [vmem:[#allocation8 + $0x68] sm:$0xff]  }
 0x47e   :  { %v581_v3 = vmul.f32 %v580_v2, %v580_v2 }
 0x480   :  { %582 = vadd.xlane.f32.xlu0 %v581_v3  ;;  %v1445_v3 = vld [vmem:[%s2393_s12] ss:$0 sm:$0xff] }
 0x50d   :  { %v583_v16 = vpop.xlane.xlu0 %582 }
 0x50e   :  { %v584_v17 = vmul.f32 0.0078125, %v583_v16 }
 0x510   :  { %v585_v18 = vadd.f32 1e-06, %v584_v17 }
 0x512   :  { %1874 = vrsqrt.f32 %v585_v18 }
 0x51c   :  { %v1875_v19 = vpop.eup %1874 }
 0x51d   :  { %v587_v21 = vmul.f32 %v1875_v19, %v580_v2 }
 0x51f   :  { %v594_v23 = vmul.f32 %v1425_v20, %v587_v21 }
 0x521   :  { %v601_v24 = vadd.f32 %v1426_v22, %v594_v23  ;;  %v1858_v22 = vld [vmem:[#allocation10 + $0x40] sm:$0xff]   ;;  %v1859_v23 = vld [vmem:[#allocation10 + $0x48] sm:$0xff]  }
 0x523   :  { %v602_v25 = vpack.c.bf16 %v601_v24, %v601_v24 }
 0x525   :  { %1680 = vmatmul.mubr.bf16.vlgmr.msra.gmra.mrb[8].mxu0 %v602_v25 }
 0x526   :  { %1719 = vmatprep.mubr.msk.bf16.mxu0 %vm2057_vm0, %v2056_v0  ;;  %1704 = vmatpush3.bf16.msra.mxu0 %v1842_v43 }
 0x527   :  { %1705 = vmatprep.subr.bf16.mxu0 %v2056_v0 }
 0x52a   :  { %1706 = vmatpush3.bf16.msra.mxu0 %v1843_v44  ;;  %v1467_v44 = vld [vmem:[%s2387_s6 + $0x1] ss:$0 sm:$0xff] }
 0x52b   :  { %1707 = vmatprep.subr.bf16.mxu0 %v2056_v0 }
 0x52e   :  { %1708 = vmatpush3.bf16.msra.mxu0 %v1844_v49 }
 0x52f   :  { %1709 = vmatprep.subr.bf16.mxu0 %v2056_v0 }
 0x532   :  { %1710 = vmatpush3.bf16.msra.mxu0 %v1845_v50  ;;  %v1872_v50 = vld [vmem:[#allocation11 + $0x70] sm:$0xff]  }
 0x533   :  { %1711 = vmatprep.subr.bf16.mxu0 %v2056_v0 }
 0x536   :  { %1712 = vmatpush3.bf16.msra.mxu0 %v1846_v51  ;;  %v1873_v51 = vld [vmem:[#allocation11 + $0x78] sm:$0xff]  }
 0x537   :  { %1713 = vmatprep.subr.bf16.mxu0 %v2056_v0 }
 0x53a   :  { %1714 = vmatpush3.bf16.msra.mxu0 %v1847_v52  ;;  %v1470_v52 = vld [vmem:[%s2390_s9 + $0x1] ss:$0 sm:$0xff] }
 0x53b   :  { %1715 = vmatprep.subr.bf16.mxu0 %v2056_v0 }
 0x53e   :  { %1716 = vmatpush3.bf16.msra.mxu0 %v1848_v53 }
 0x53f   :  { %1717 = vmatprep.subr.bf16.mxu0 %v2056_v0 }
 0x542   :  { %1718 = vmatpush3.bf16.msra.mxu0 %v1849_v54 }
 0x543   :  { %1743 = vmatprep.subr.bf16.mxu0 %v2056_v0 }
 0x5f8   :  { %v708_v29 = vpop.f32.mrb[8].mxu0 }
 0x5f9   :  { %v709_v30 = vadd.f32 %v1427_v28, %v708_v29  ;;  %v1681_v31 = vpop.f32.mrb[9].mxu0  ;;  %v1860_v28 = vld [vmem:[#allocation10 + $0x50] sm:$0xff]   ;;  %v1861_v29 = vld [vmem:[#allocation10 + $0x58] sm:$0xff]  }
 0x5fa   :  { %v711_v32 = vpop.f32.mrb[10].mxu0  ;;  %v1863_v31 = vld [vmem:[#allocation10 + $0x68] sm:$0xff]  }
 0x5fb   :  { %v714_v33 = vmax.f32 %v709_v30, 0.0  ;;  %v1682_v34 = vpop.f32.mrb[11].mxu0  ;;  %v1862_v30 = vld [vmem:[#allocation10 + $0x60] sm:$0xff]   ;;  %v1864_v32 = vld [vmem:[#allocation10 + $0x70] sm:$0xff]  }
 0x5fc   :  { %v1866_v34 = vld [vmem:[#allocation11 + $0x40] sm:$0xff]  }
 0x5fd   :  { %v715_v35 = vpack.c.bf16 %v714_v33, %v714_v33  ;;  %v1865_v33 = vld [vmem:[#allocation10 + $0x78] sm:$0xff]  }
 0x5ff   :  { %1700 = vmatmul.mubr.bf16.vlgmr.msra.gmra.mrb[8].mxu1 %v715_v35  ;;  %v1867_v35 = vld [vmem:[#allocation11 + $0x48] sm:$0xff]  }
 0x600   :  { %1739 = vmatprep.mubr.msk.bf16.mxu1 %vm2057_vm0, %v2056_v0  ;;  %1724 = vmatpush3.bf16.msra.mxu1 %v1850_v55 }
 0x601   :  { %1725 = vmatprep.subr.bf16.mxu1 %v2056_v0 }
 0x604   :  { %1726 = vmatpush3.bf16.msra.mxu1 %v1851_v56 }
 0x605   :  { %1727 = vmatprep.subr.bf16.mxu1 %v2056_v0 }
 0x608   :  { %1728 = vmatpush3.bf16.msra.mxu1 %v1852_v57 }
 0x609   :  { %1729 = vmatprep.subr.bf16.mxu1 %v2056_v0 }
 0x60c   :  { %1730 = vmatpush3.bf16.msra.mxu1 %v1853_v58 }
 0x60d   :  { %1731 = vmatprep.subr.bf16.mxu1 %v2056_v0 }
 0x610   :  { %1732 = vmatpush3.bf16.msra.mxu1 %v1854_v59 }
 0x611   :  { %1733 = vmatprep.subr.bf16.mxu1 %v2056_v0 }
 0x614   :  { %1734 = vmatpush3.bf16.msra.mxu1 %v1855_v60  ;;  %v1480_v60 = vld [vmem:[%s2392_s11 + $0x1] ss:$0 sm:$0xff] }
 0x615   :  { %1735 = vmatprep.subr.bf16.mxu1 %v2056_v0 }
 0x618   :  { %1736 = vmatpush3.bf16.msra.mxu1 %v1856_v61 }
 0x619   :  { %1737 = vmatprep.subr.bf16.mxu1 %v2056_v0 }
 0x61c   :  { %1738 = vmatpush3.bf16.msra.mxu1 %v1857_v9 }
 0x61d   :  { %1763 = vmatprep.subr.bf16.mxu1 %v2056_v0 }
 0x6d2   :  { %v821_v37 = vpop.f32.mrb[8].mxu1 }
 0x6d3   :  { %v822_v38 = vadd.f32 %v1436_v36, %v821_v37  ;;  %v1701_v39 = vpop.f32.mrb[9].mxu1  ;;  %v1868_v36 = vld [vmem:[#allocation11 + $0x50] sm:$0xff]   ;;  %v1869_v37 = vld [vmem:[#allocation11 + $0x58] sm:$0xff]  }
 0x6d4   :  { %v824_v40 = vpop.f32.mrb[10].mxu1  ;;  %v1871_v39 = vld [vmem:[#allocation11 + $0x68] sm:$0xff]  }
 0x6d5   :  { %v1702_v41 = vpop.f32.mrb[11].mxu1  ;;  %v827_v42 = vadd.f32 %v822_v38, %v601_v24  ;;  %v1870_v38 = vld [vmem:[#allocation11 + $0x60] sm:$0xff]  }
 0x6d7   :  { %830 = vadd.xlane.f32.xlu1 %v827_v42 }
 0x764   :  { %v831_v45 = vpop.xlane.xlu1 %830 }
 0x765   :  { %v832_v46 = vmul.f32 0.0078125, %v831_v45 }
 0x767   :  { %v833_v47 = vsub.f32 %v827_v42, %v832_v46  ;;  %v1468_v46 = vld [vmem:[%s2388_s7 + $0x1] ss:$0 sm:$0xff] }
 0x769   :  { %v834_v48 = vmul.f32 %v833_v47, %v833_v47 }
 0x76b   :  { %835 = vadd.xlane.f32.xlu1 %v834_v48 }
 0x7f8   :  { %v836_v62 = vpop.xlane.xlu1 %835 }
 0x7f9   :  { %v837_v63 = vmul.f32 0.0078125, %v836_v62 }
 0x7fb   :  { %v838_v1 = vadd.f32 1e-06, %v837_v63 }
 0x7fd   :  { %1876 = vrsqrt.f32 %v838_v1 }
 0x807   :  { %v1877_v2 = vpop.eup %1876 }
 0x808   :  { %v840_v4 = vmul.f32 %v1877_v2, %v833_v47 }
 0x80a   :  { %v847_v6 = vmul.f32 %v1445_v3, %v840_v4 }
 0x80c   :  { %v854_v7 = vadd.f32 %v1446_v5, %v847_v6 }
 0x80e   :  { %v855_v8 = vpack.c.bf16 %v854_v7, %v854_v7 }
 0x810   :  { %1720 = vmatmul.mubr.bf16.vlgmr.msra.gmra.mrb[12].mxu0 %v855_v8 }
 0x811   :  { %1759 = vmatprep.mubr.msk.bf16.mxu0 %vm2057_vm0, %v2056_v0  ;;  %1744 = vmatpush3.bf16.msra.mxu0 %v1858_v22 }
 0x812   :  { %1745 = vmatprep.subr.bf16.mxu0 %v2056_v0 }
 0x815   :  { %1746 = vmatpush3.bf16.msra.mxu0 %v1859_v23 }
 0x816   :  { %1747 = vmatprep.subr.bf16.mxu0 %v2056_v0 }
 0x819   :  { %1748 = vmatpush3.bf16.msra.mxu0 %v1860_v28 }
 0x81a   :  { %1749 = vmatprep.subr.bf16.mxu0 %v2056_v0 }
 0x81d   :  { %1750 = vmatpush3.bf16.msra.mxu0 %v1861_v29 }
 0x81e   :  { %1751 = vmatprep.subr.bf16.mxu0 %v2056_v0 }
 0x821   :  { %1752 = vmatpush3.bf16.msra.mxu0 %v1862_v30 }
 0x822   :  { %1753 = vmatprep.subr.bf16.mxu0 %v2056_v0 }
 0x825   :  { %1754 = vmatpush3.bf16.msra.mxu0 %v1863_v31 }
 0x826   :  { %1755 = vmatprep.subr.bf16.mxu0 %v2056_v0 }
 0x829   :  { %1756 = vmatpush3.bf16.msra.mxu0 %v1864_v32 }
 0x82a   :  { %1757 = vmatprep.subr.bf16.mxu0 %v2056_v0 }
 0x82d   :  { %1758 = vmatpush3.bf16.msra.mxu0 %v1865_v33 }
 0x8e3   :  { %v955_v10 = vpop.f32.mrb[12].mxu0 }
 0x8e4   :  { %v961_v11 = vpack.c.bf16 %v955_v10, %v955_v10  ;;  %v1721_v12 = vpop.f32.mrb[13].mxu0 }
 0x8e5   :  { %v958_v13 = vpop.f32.mrb[14].mxu0 }
 0x8e6   :  { %v1722_v14 = vpop.f32.mrb[15].mxu0  ;;  %1740 = vmatmul.mubr.bf16.vlgmr.msra.gmra.mrb[12].mxu1 %v961_v11  ;;  %v1491_v11 = vld [vmem:[%s2393_s12 + $0x1] ss:$0 sm:$0xff] }
 0x8e7   :  { %1779 = vmatprep.mubr.msk.bf16.mxu1 %vm2057_vm0, %v2056_v0  ;;  %1764 = vmatpush3.bf16.msra.mxu1 %v1866_v34  ;;  %v1492_v13 = vld [vmem:[%s2394_s13 + $0x1] ss:$0 sm:$0xff] }
 0x8e8   :  { %1765 = vmatprep.subr.bf16.mxu1 %v2056_v0 }
 0x8eb   :  { %1766 = vmatpush3.bf16.msra.mxu1 %v1867_v35 }
 0x8ec   :  { %1767 = vmatprep.subr.bf16.mxu1 %v2056_v0 }
 0x8ef   :  { %1768 = vmatpush3.bf16.msra.mxu1 %v1868_v36 }
 0x8f0   :  { %1769 = vmatprep.subr.bf16.mxu1 %v2056_v0 }
 0x8f3   :  { %1770 = vmatpush3.bf16.msra.mxu1 %v1869_v37 }
 0x8f4   :  { %1771 = vmatprep.subr.bf16.mxu1 %v2056_v0 }
 0x8f7   :  { %1772 = vmatpush3.bf16.msra.mxu1 %v1870_v38 }
 0x8f8   :  { %1773 = vmatprep.subr.bf16.mxu1 %v2056_v0 }
 0x8fb   :  { %1774 = vmatpush3.bf16.msra.mxu1 %v1871_v39 }
 0x8fc   :  { %1775 = vmatprep.subr.bf16.mxu1 %v2056_v0 }
 0x8ff   :  { %1776 = vmatpush3.bf16.msra.mxu1 %v1872_v50 }
 0x900   :  { %1777 = vmatprep.subr.bf16.mxu1 %v2056_v0 }
 0x903   :  { %1778 = vmatpush3.bf16.msra.mxu1 %v1873_v51 }
 0x9b9   :  { %v1069_v16 = vpop.f32.mrb[12].mxu1 }
 0x9ba   :  { %v1070_v17 = vadd.f32 %v1456_v15, %v1069_v16  ;;  %v1741_v18 = vpop.f32.mrb[13].mxu1 }
 0x9bb   :  { %v1072_v19 = vpop.f32.mrb[14].mxu1 }
 0x9bc   :  { %v1742_v20 = vpop.f32.mrb[15].mxu1  ;;  %v1075_v21 = vadd.f32 %v1070_v17, %v854_v7 }
 0x9be   :  { %1080 = vadd.xlane.f32.xlu0 %v1075_v21 }
 0xa4b   :  { %v1081_v24 = vpop.xlane.xlu0 %1080 }
 0xa4c   :  { %v1082_v25 = vmul.f32 0.0078125, %v1081_v24 }
 0xa4e   :  { %v1083_v26 = vsub.f32 %v1075_v21, %v1082_v25 }
 0xa50   :  { %v1084_v27 = vmul.f32 %v1083_v26, %v1083_v26 }
 0xa52   :  { %1085 = vadd.xlane.f32.xlu1 %v1084_v27 }
 0xadf   :  { %v1086_v40 = vpop.xlane.xlu1 %1085 }
 0xae0   :  { %v1087_v41 = vmul.f32 0.0078125, %v1086_v40 }
 0xae2   :  { %v1088_v42 = vadd.f32 1e-06, %v1087_v41 }
 0xae4   :  { %1878 = vrsqrt.f32 %v1088_v42 }
 0xaee   :  { %v1879_v43 = vpop.eup %1878 }
 0xaef   :  { %v1090_v45 = vmul.f32 %v1879_v43, %v1083_v26 }
 0xaf1   :  { %v1097_v47 = vmul.f32 %v1467_v44, %v1090_v45 }
 0xaf3   :  { %v1104_v48 = vadd.f32 %v1468_v46, %v1097_v47 }
 0xaf5   :  { %v1105_v49 = vpack.c.bf16 %v1104_v48, %v1104_v48 }
 0xaf7   :  { %1760 = vmatmul.mubr.bf16.vlgmr.msra.gmra.mrb[16].mxu0 %v1105_v49 }
 0xbca   :  { %v1213_v53 = vpop.f32.mrb[16].mxu0 }
 0xbcb   :  { %v1214_v54 = vadd.f32 %v1470_v52, %v1213_v53  ;;  %v1761_v55 = vpop.f32.mrb[17].mxu0 }
 0xbcc   :  { %v1216_v56 = vpop.f32.mrb[18].mxu0 }
 0xbcd   :  { %v1219_v57 = vmax.f32 %v1214_v54, 0.0  ;;  %v1762_v58 = vpop.f32.mrb[19].mxu0 }
 0xbcf   :  { %v1220_v59 = vpack.c.bf16 %v1219_v57, %v1219_v57 }
 0xbd1   :  { %1780 = vmatmul.mubr.bf16.vlgmr.msra.gmra.mrb[16].mxu1 %v1220_v59 }
 0xca4   :  { %v1328_v61 = vpop.f32.mrb[16].mxu1 }
 0xca5   :  { %v1329_v0 = vadd.f32 %v1480_v60, %v1328_v61  ;;  %v1781_v62 = vpop.f32.mrb[17].mxu1 }
 0xca6   :  { %v1331_v63 = vpop.f32.mrb[18].mxu1 }
 0xca7   :  { %v1782_v1 = vpop.f32.mrb[19].mxu1  ;;  %v1334_v2 = vadd.f32 %v1329_v0, %v1104_v48 }
 0xca9   :  { %1339 = vadd.xlane.f32.xlu0 %v1334_v2 }
 0xd36   :  { %v1340_v3 = vpop.xlane.xlu0 %1339 }
 0xd37   :  { %v1341_v4 = vmul.f32 0.0078125, %v1340_v3 }
 0xd39   :  { %v1342_v5 = vsub.f32 %v1334_v2, %v1341_v4 }
 0xd3b   :  { %v1343_v6 = vmul.f32 %v1342_v5, %v1342_v5 }
 0xd3d   :  { %1344 = vadd.xlane.f32.xlu1 %v1343_v6 }
 0xdca   :  { %v1345_v7 = vpop.xlane.xlu1 %1344 }
 0xdcb   :  { %v1346_v8 = vmul.f32 0.0078125, %v1345_v7 }
 0xdcd   :  { %v1347_v9 = vadd.f32 1e-06, %v1346_v8 }
 0xdcf   :  { %1880 = vrsqrt.f32 %v1347_v9 }
 0xdd9   :  { %v1881_v10 = vpop.eup %1880 }
 0xdda   :  { %v1349_v12 = vmul.f32 %v1881_v10, %v1342_v5 }
 0xddc   :  { %v1356_v14 = vmul.f32 %v1491_v11, %v1349_v12 }
 0xdde   :  { %v1363_v15 = vadd.f32 %v1492_v13, %v1356_v14 }
 0xde0   :  { %v1364_v16 = vmul.f32 %v1363_v15, %v1363_v15 }
 0xde2   :  { %1365 = vadd.xlane.f32.xlu0 %v1364_v16 }
 0xe6f   :  { %v1366_v17 = vpop.xlane.xlu0 %1365 }
 0xe70   :  { %v1367_v18 = vmax.f32 %v1366_v17, 1e-24 }
 0xe72   :  { %1882 = vrsqrt.f32 %v1367_v18 }
 0xe7c   :  { %v1883_v19 = vpop.eup %1882 }
 0xe7d   :  { %v1369_v20 = vmul.f32 %v1883_v19, %v1363_v15 }
 0xe7f   :  { %1370 = vst [vmem:[#allocation13] sm:$0xff] %v1369_v20 }
 0xe80   :  { %2027 = shalt.err (!%p2024_p10)
}
 0xe81   :  { %s2028_s26 = scalar_lea.hbm %s2395_s14, 128 }
 0xe82   :  { %p2029_p11 = scmp.ne.s32.totalorder %s2395_s14, %s2028_s26  ;;  %p2032_p12 = scmp.lt.u32.totalorder %s2028_s26, %s2395_s14 }
 0xe84   :  { %p2034_p13 = pnand %p2032_p12, %p2029_p11 }
 0xe86   :  { %2037 = shalt.err (!%p2034_p13)
}
 0xe87   :  { %1380 = dma.vmem_to_hbm [thread:$0]  %s1378_s1, 128, %s2395_s14, [#allocation4]  }
 0xe88   :  { %2046 = dma.done.wait [#allocation4], 128  }
 0xe89   :  { %2047 = vsyncadd [#allocation4], 4294967168 }
 0xe8a   :  { %1384 = vsyncpa [#allocation3], 1 }
 0xe8b   :  { %1385 = vsyncpa [#allocation6], 1 }
 0xe8c   :  { %1386 = vsyncpa [#allocation9], 1 }
 0xe8d   :  { %1387 = vsyncpa [#allocation12], 1 }
 0xe8e   :  { %1388 = vsyncpa [#allocation4], 1 }

</bundles_post_ra>
